<compile_context>
chip_gen: v6e
topology: v6e:2x2x1
jax: 0.10.0
libtpu: 0.0.40
codegen_flags: <defaults>
</compile_context>

<pallas_src>
import functools

import numpy as np
import jax
import jax.numpy as jnp
from jax.experimental import pallas as pl
from jax.experimental.pallas import tpu as pltpu


def _pick_seq_block(n, cap=16):
    """Largest divisor of n that is <= cap, preferring >= 2 grid steps (megacore)."""
    divs = [d for d in range(1, n + 1) if n % d == 0 and d <= cap]
    multi = [d for d in divs if n // d >= 2]
    return max(multi) if multi else max(divs)


# -----------------------------------------------------------------------------
# Attention kernel: LayerNorm -> fused-head QKV -> (QK^T + rel_pos_bias) softmax
#                   -> attn @ V -> output proj -> + residual
# Processes Bn sequences per grid step; heads and sequences are folded into one
# leading batch dimension (G = H*Bn) for the score / context / output matmuls.
# -----------------------------------------------------------------------------
def _attention_kernel(x_ref, lng_ref, lnb_ref, wq_ref, wk_ref, wv_ref, wo_ref,
                      bias_ref, o_ref, *, heads, dim_head, scale):
    Bn, S, C = x_ref.shape
    H, D = heads, dim_head
    HD = H * D
    G = H * Bn

    x = x_ref[...]                                 # (Bn, S, C) f32
    g = lng_ref[0]                                 # (C,)
    b = lnb_ref[0]                                 # (C,)

    # nn.LayerNorm(dim), eps=1e-5, biased variance (f32 statistics)
    mean = jnp.mean(x, axis=-1, keepdims=True)
    var = jnp.mean((x - mean) ** 2, axis=-1, keepdims=True)
    xn = (x - mean) * jax.lax.rsqrt(var + 1e-5) * g + b

    xb = xn.astype(jnp.bfloat16)                   # bf16 operands, f32 accumulation

    def project(w_ref):                            # (Bn, S, C) @ (C, HD) -> (Bn, S, HD)
        wb = jnp.broadcast_to(w_ref[...], (Bn, C, HD))
        return jax.lax.dot_general(xb, wb, (((2,), (1,)), ((0,), (0,))),
                                   preferred_element_type=jnp.float32)

    q = project(wq_ref) * scale                    # fused-head projections
    k = project(wk_ref)
    v = project(wv_ref)

    def to_head_major(t):                          # (Bn, S, HD) f32 -> (H*Bn, S, D) bf16
        parts = [t[:, :, hh * D:(hh + 1) * D] for hh in range(H)]
        return jnp.concatenate(parts, axis=0).astype(jnp.bfloat16)

    qg = to_head_major(q)
    kg = to_head_major(k)
    vg = to_head_major(v)

    # scores: (G, S, D) x (G, S, D) -> (G, S, S), batched over heads x sequences
    sim = jax.lax.dot_general(qg, kg, (((2,), (2,)), ((0,), (0,))),
                              preferred_element_type=jnp.float32)
    bias = jnp.broadcast_to(bias_ref[...][:, None], (H, Bn, S, S)).reshape(G, S, S)
    sim = sim + bias

    # numerically stable softmax (f32), divide via EUP reciprocal
    sim = sim - jnp.max(sim, axis=-1, keepdims=True)
    p = jnp.exp(sim)
    p = p * pl.reciprocal(jnp.sum(p, axis=-1, keepdims=True), approx=True)

    # context: (G, S, S) x (G, S, D) -> (G, S, D)
    ctx = jax.lax.dot_general(p.astype(jnp.bfloat16), vg, (((2,), (1,)), ((0,), (0,))),
                              preferred_element_type=jnp.float32)

    # output projection, batched over heads x sequences, then reduce over heads
    wo_g = jnp.broadcast_to(wo_ref[...][:, None], (H, Bn, D, C)).reshape(G, D, C)
    og = jax.lax.dot_general(ctx.astype(jnp.bfloat16), wo_g, (((2,), (1,)), ((0,), (0,))),
                             preferred_element_type=jnp.float32)        # (G, S, C)

    out = x + og[0:Bn]                             # residual + head 0
    for hh in range(1, H):
        out = out + og[hh * Bn:(hh + 1) * Bn]
    o_ref[...] = out


def attention_pallas(x, ln_g, ln_b, wq, wk, wv, wo, rel_pos_bias,
                     *, heads, dim_head, scale):
    N, S, C = x.shape
    HD = heads * dim_head
    Bn = _pick_seq_block(N, cap=16)
    kernel = functools.partial(_attention_kernel, heads=heads, dim_head=dim_head,
                               scale=scale)
    full2 = lambda i: (0, 0)
    full3 = lambda i: (0, 0, 0)

    flops = 8 * N * S * C * HD + 4 * N * heads * S * S * dim_head
    transcendentals = N * heads * S * S
    bytes_accessed = 2 * N * S * C * 4 + 4 * C * HD * 2 + heads * S * S * 4

    return pl.pallas_call(
        kernel,
        out_shape=jax.ShapeDtypeStruct((N, S, C), x.dtype),
        grid=(N // Bn,),
        in_specs=[
            pl.BlockSpec((Bn, S, C), lambda i: (i, 0, 0)),
            pl.BlockSpec((1, C), full2),
            pl.BlockSpec((1, C), full2),
            pl.BlockSpec((C, HD), full2),
            pl.BlockSpec((C, HD), full2),
            pl.BlockSpec((C, HD), full2),
            pl.BlockSpec((heads, dim_head, C), full3),
            pl.BlockSpec((heads, S, S), full3),
        ],
        out_specs=pl.BlockSpec((Bn, S, C), lambda i: (i, 0, 0)),
        compiler_params=pltpu.CompilerParams(
            dimension_semantics=("parallel",),
            vmem_limit_bytes=32 * 1024 * 1024),
        cost_estimate=pl.CostEstimate(flops=flops, transcendentals=transcendentals,
                                      bytes_accessed=bytes_accessed),
    )(x, ln_g, ln_b, wq, wk, wv, wo, rel_pos_bias)


# -----------------------------------------------------------------------------
# FeedForward kernel: 1x1 Conv3d (channel matmul) + GEGLU, temporal shift_token
# (second half of hidden channels shifted forward one frame), ChanLayerNorm,
# 1x1 Conv3d back to dim, + residual.  One batch element (all F*HW tokens)
# per grid step; no per-frame loop.  Hidden channels are kept as (keep | rest)
# halves so the token shift needs no lane-dim concatenation.
# -----------------------------------------------------------------------------
def _ff_kernel(x_ref, w1x1_ref, w1x2_ref, w1g1_ref, w1g2_ref,
               g1_ref, g2_ref, w2a_ref, w2b_ref, o_ref,
               *, hw, inner_dim, enable_time):
    x = x_ref[0]                                   # (M, C) f32, M = F*HW
    xb = x.astype(jnp.bfloat16)

    a1 = jnp.dot(xb, w1x1_ref[...], preferred_element_type=jnp.float32)   # (M, keep)
    a2 = jnp.dot(xb, w1x2_ref[...], preferred_element_type=jnp.float32)   # (M, rest)
    g1t = jnp.dot(xb, w1g1_ref[...], preferred_element_type=jnp.float32)
    g2t = jnp.dot(xb, w1g2_ref[...], preferred_element_type=jnp.float32)

    # GEGLU (exact erf GELU, matching F.gelu default)
    act1 = a1 * jax.nn.gelu(g1t, approximate=False)
    act2 = a2 * jax.nn.gelu(g2t, approximate=False)

    if enable_time:
        # shift_token: second-half channels take previous frame's values,
        # frame 0 gets zeros.  Frame shift == sublane roll by HW rows + mask.
        rolled = pltpu.roll(act2, shift=hw, axis=0)
        rows = jax.lax.broadcasted_iota(jnp.int32, rolled.shape, 0)
        act2 = jnp.where(rows < hw, 0.0, rolled)

    # ChanLayerNorm over all inner_dim channels (biased var, clamp(min=eps))
    inv_inner = 1.0 / inner_dim
    mean = (jnp.sum(act1, axis=-1, keepdims=True)
            + jnp.sum(act2, axis=-1, keepdims=True)) * inv_inner
    var = (jnp.sum((act1 - mean) ** 2, axis=-1, keepdims=True)
           + jnp.sum((act2 - mean) ** 2, axis=-1, keepdims=True)) * inv_inner
    inv = jax.lax.rsqrt(jnp.maximum(var, 1e-5))
    n1 = ((act1 - mean) * inv * g1_ref[0]).astype(jnp.bfloat16)
    n2 = ((act2 - mean) * inv * g2_ref[0]).astype(jnp.bfloat16)

    out = (jnp.dot(n1, w2a_ref[...], preferred_element_type=jnp.float32)
           + jnp.dot(n2, w2b_ref[...], preferred_element_type=jnp.float32)
           + x)                                    # residual
    o_ref[0] = out


def feedforward_pallas(x, fp, *, hw, enable_time):
    B, M, C = x.shape                              # x is (b, f*h*w, c)
    keep = fp["w1x1"].shape[1]
    rest = fp["w1x2"].shape[1]
    inner = keep + rest
    kernel = functools.partial(_ff_kernel, hw=hw, inner_dim=inner,
                               enable_time=enable_time)
    full2 = lambda i: (0, 0)

    flops = 6 * B * M * C * inner
    transcendentals = B * M * inner
    bytes_accessed = 2 * B * M * C * 4 + 3 * inner * C * 2 + inner * 4

    return pl.pallas_call(
        kernel,
        out_shape=jax.ShapeDtypeStruct(x.shape, x.dtype),
        grid=(B,),
        in_specs=[
            pl.BlockSpec((1, M, C), lambda i: (i, 0, 0)),
            pl.BlockSpec((C, keep), full2),
            pl.BlockSpec((C, rest), full2),
            pl.BlockSpec((C, keep), full2),
            pl.BlockSpec((C, rest), full2),
            pl.BlockSpec((1, keep), full2),
            pl.BlockSpec((1, rest), full2),
            pl.BlockSpec((keep, C), full2),
            pl.BlockSpec((rest, C), full2),
        ],
        out_specs=pl.BlockSpec((1, M, C), lambda i: (i, 0, 0)),
        compiler_params=pltpu.CompilerParams(
            dimension_semantics=("parallel",),
            vmem_limit_bytes=32 * 1024 * 1024),
        cost_estimate=pl.CostEstimate(flops=flops, transcendentals=transcendentals,
                                      bytes_accessed=bytes_accessed),
    )(x, fp["w1x1"], fp["w1x2"], fp["w1g1"], fp["w1g2"],
      fp["g1"], fp["g2"], fp["w2a"], fp["w2b"])


# -----------------------------------------------------------------------------
# ContinuousPositionBias — tiny MLP over relative positions + gather.
# Pure JAX glue (parameter-setup style).
# -----------------------------------------------------------------------------
def continuous_position_bias(p, dims):
    nd = len(dims)
    shape_arr = np.array(dims, dtype=np.int64)
    rel_pos_shape = 2 * shape_arr - 1
    s = np.cumprod(rel_pos_shape[::-1])
    strides = np.concatenate([[1], s[:-1]])[::-1]

    grids = np.stack(np.meshgrid(*[np.arange(d) for d in dims], indexing="ij"),
                     axis=-1).reshape(-1, nd)
    rel_dist = grids[:, None, :] - grids[None, :, :]
    idx = ((rel_dist + (shape_arr - 1)) * strides).sum(-1)          # (P, P), static

    rel_pos_grid = np.stack(
        np.meshgrid(*[np.arange(-d + 1, d) for d in dims], indexing="ij"),
        axis=-1).reshape(-1, nd).astype(np.float32)

    bias = jnp.asarray(rel_pos_grid)
    bias = jax.nn.silu(bias @ p["w0"] + p["b0"])
    bias = jax.nn.silu(bias @ p["w1"] + p["b1"])
    bias = bias @ p["w2"] + p["b2"]                                  # (R, heads)
    bias = bias[jnp.asarray(idx)]                                    # (P, P, heads)
    return jnp.transpose(bias, (2, 0, 1)).astype(jnp.float32)        # (heads, P, P)


# -----------------------------------------------------------------------------
# Parameter init (deterministic; shapes follow the PyTorch module __init__).
# Projection weights are stored in bf16 (MXU-native); norm params stay f32.
# -----------------------------------------------------------------------------
def init_params(key, dim, dim_head, heads, ff_mult=4):
    cpb_dim = dim // 2
    ff_inner = int(dim * ff_mult * 2 / 3)
    keep = (ff_inner + 1) // 2            # torch.chunk first-half size
    rest = ff_inner - keep
    hd = heads * dim_head

    keys = iter(jax.random.split(key, 40))

    def nrm(shape, scale=0.1, dtype=jnp.float32):
        return (jax.random.normal(next(keys), shape, jnp.float32) * scale).astype(dtype)

    def attn_params():
        return dict(
            ln_g=jnp.ones((1, dim), jnp.float32),
            ln_b=jnp.zeros((1, dim), jnp.float32),
            wq=nrm((dim, hd), dtype=jnp.bfloat16),
            wk=nrm((dim, hd), dtype=jnp.bfloat16),
            wv=nrm((dim, hd), dtype=jnp.bfloat16),
            wo=nrm((heads, dim_head, dim), dtype=jnp.bfloat16),  # torch zero-inits
        )

    def cpb_params(num_dims):
        return dict(
            w0=nrm((num_dims, cpb_dim)), b0=nrm((cpb_dim,)),
            w1=nrm((cpb_dim, cpb_dim)), b1=nrm((cpb_dim,)),
            w2=nrm((cpb_dim, heads)), b2=nrm((heads,)),
        )

    ff = dict(
        w1x1=nrm((dim, keep), dtype=jnp.bfloat16),
        w1x2=nrm((dim, rest), dtype=jnp.bfloat16),
        w1g1=nrm((dim, keep), dtype=jnp.bfloat16),
        w1g2=nrm((dim, rest), dtype=jnp.bfloat16),
        g1=jnp.ones((1, keep), jnp.float32),
        g2=jnp.ones((1, rest), jnp.float32),
        w2a=nrm((keep, dim), dtype=jnp.bfloat16),
        w2b=nrm((rest, dim), dtype=jnp.bfloat16),
    )

    return dict(
        spatial_attn=attn_params(), spatial_cpb=cpb_params(2),
        temporal_attn=attn_params(), temporal_cpb=cpb_params(1),
        ff=ff, scale=float(dim_head) ** -0.5, heads=heads, dim_head=dim_head,
    )


# -----------------------------------------------------------------------------
# SpatioTemporalAttention forward
# -----------------------------------------------------------------------------
def spatio_temporal_attention(params, x, enable_time=True):
    assert x.ndim == 5, "expects video input (b, c, f, h, w)"
    b, c, f, h, w = x.shape
    scale = params["scale"]
    heads = params["heads"]
    dim_head = params["dim_head"]

    # channels-last working layout, kept between all Pallas calls
    xcl = jnp.transpose(x, (0, 2, 3, 4, 1))                     # (b, f, h, w, c)

    # spatial attention: 'b c f h w -> (b f) (h w) c'
    xs = xcl.reshape(b * f, h * w, c)
    sp = params["spatial_attn"]
    space_bias = continuous_position_bias(params["spatial_cpb"], (h, w))
    xs = attention_pallas(xs, sp["ln_g"], sp["ln_b"], sp["wq"], sp["wk"], sp["wv"],
                          sp["wo"], space_bias, heads=heads, dim_head=dim_head,
                          scale=scale)
    xcl = xs.reshape(b, f, h, w, c)

    # temporal attention: '(b f) (h w) c -> (b h w) f c'
    if enable_time:
        xt = jnp.transpose(xcl, (0, 2, 3, 1, 4)).reshape(b * h * w, f, c)
        tp = params["temporal_attn"]
        time_bias = continuous_position_bias(params["temporal_cpb"], (f,))
        xt = attention_pallas(xt, tp["ln_g"], tp["ln_b"], tp["wq"], tp["wk"], tp["wv"],
                              tp["wo"], time_bias, heads=heads, dim_head=dim_head,
                              scale=scale)
        xcl = jnp.transpose(xt.reshape(b, h, w, f, c), (0, 3, 1, 2, 4))

    # feed-forward (1x1 Conv3d == channel matmul) on flattened tokens (b, f*h*w, c)
    xf = xcl.reshape(b, f * h * w, c)
    xf = feedforward_pallas(xf, params["ff"], hw=h * w, enable_time=enable_time)
    xcl = xf.reshape(b, f, h, w, c)

    # back to PyTorch layout (b, c, f, h, w)
    return jnp.transpose(xcl, (0, 4, 1, 2, 3))


if __name__ == "__main__":
    dim, dim_head, heads = 24, 8, 4     # ff inner = int(24*4*2/3) = 64
    b, f, h, w = 2, 4, 4, 4

    key = jax.random.PRNGKey(0)
    pkey, xkey = jax.random.split(key)
    params = init_params(pkey, dim, dim_head, heads, ff_mult=4)
    x = jax.random.normal(xkey, (b, dim, f, h, w), jnp.float32)

    out = spatio_temporal_attention(params, x, enable_time=True)
    out = jax.block_until_ready(out)
    assert out.shape == x.shape and out.dtype == jnp.float32
    assert bool(jnp.all(jnp.isfinite(out)))
    print("KERNEL_OK")
</pallas_src>

<mosaic_0001>
module attributes {stable_mosaic.version = 11 : i64} {
  func.func @_attention_kernel(%arg0: i32, %arg1: memref<4x16x24xf32, #tpu.memory_space<vmem>>, %arg2: memref<1x24xf32, #tpu.memory_space<vmem>>, %arg3: memref<1x24xf32, #tpu.memory_space<vmem>>, %arg4: memref<24x32xbf16, #tpu.memory_space<vmem>>, %arg5: memref<24x32xbf16, #tpu.memory_space<vmem>>, %arg6: memref<24x32xbf16, #tpu.memory_space<vmem>>, %arg7: memref<4x8x24xbf16, #tpu.memory_space<vmem>>, %arg8: memref<4x16x16xf32, #tpu.memory_space<vmem>>, %arg9: memref<4x16x24xf32, #tpu.memory_space<vmem>>) attributes {dimension_semantics = [#tpu.dimension_semantics<parallel>], iteration_bounds = array<i64: 2>, scalar_prefetch = 0 : i64, scratch_operands = 0 : i64, tpu.core_type = #tpu.core_type<tc>, window_params = [{transform_indices = @transform_0, window_bounds = array<i64: 4, 16, 24>}, {pipeline_mode = #tpu.pipeline_mode<synchronous>, transform_indices = @transform_1, window_bounds = array<i64: 1, 24>}, {pipeline_mode = #tpu.pipeline_mode<synchronous>, transform_indices = @transform_2, window_bounds = array<i64: 1, 24>}, {pipeline_mode = #tpu.pipeline_mode<synchronous>, transform_indices = @transform_3, window_bounds = array<i64: 24, 32>}, {pipeline_mode = #tpu.pipeline_mode<synchronous>, transform_indices = @transform_4, window_bounds = array<i64: 24, 32>}, {pipeline_mode = #tpu.pipeline_mode<synchronous>, transform_indices = @transform_5, window_bounds = array<i64: 24, 32>}, {pipeline_mode = #tpu.pipeline_mode<synchronous>, transform_indices = @transform_6, window_bounds = array<i64: 4, 8, 24>}, {pipeline_mode = #tpu.pipeline_mode<synchronous>, transform_indices = @transform_7, window_bounds = array<i64: 4, 16, 16>}, {transform_indices = @transform_8, window_bounds = array<i64: 4, 16, 24>}]} {
    %c0 = arith.constant 0 : index
    %c0_0 = arith.constant 0 : index
    %c0_1 = arith.constant 0 : index
    %0 = vector.load %arg1[%c0, %c0_0, %c0_1] : memref<4x16x24xf32, #tpu.memory_space<vmem>>, vector<4x16x24xf32>
    %c0_2 = arith.constant 0 : index
    %c0_3 = arith.constant 0 : index
    %1 = vector.load %arg2[%c0_2, %c0_3] : memref<1x24xf32, #tpu.memory_space<vmem>>, vector<1x24xf32>
    %2 = vector.shape_cast %1 : vector<1x24xf32> to vector<24xf32>
    %c0_4 = arith.constant 0 : index
    %c0_5 = arith.constant 0 : index
    %3 = vector.load %arg3[%c0_4, %c0_5] : memref<1x24xf32, #tpu.memory_space<vmem>>, vector<1x24xf32>
    %4 = vector.shape_cast %3 : vector<1x24xf32> to vector<24xf32>
    %cst = arith.constant dense<0.000000e+00> : vector<4x16xf32>
    %5 = vector.multi_reduction <add>, %0, %cst [2] : vector<4x16x24xf32> to vector<4x16xf32>
    %6 = vector.shape_cast %5 : vector<4x16xf32> to vector<4x16x1xf32>
    %cst_6 = arith.constant 2.400000e+01 : f32
    %7 = vector.broadcast %cst_6 : f32 to vector<4x16x1xf32>
    %8 = arith.divf %6, %7 : vector<4x16x1xf32>
    %9 = vector.broadcast %8 : vector<4x16x1xf32> to vector<4x16x24xf32>
    %10 = arith.subf %0, %9 : vector<4x16x24xf32>
    %11 = arith.mulf %10, %10 : vector<4x16x24xf32>
    %cst_7 = arith.constant dense<0.000000e+00> : vector<4x16xf32>
    %12 = vector.multi_reduction <add>, %11, %cst_7 [2] : vector<4x16x24xf32> to vector<4x16xf32>
    %13 = vector.shape_cast %12 : vector<4x16xf32> to vector<4x16x1xf32>
    %cst_8 = arith.constant 2.400000e+01 : f32
    %14 = vector.broadcast %cst_8 : f32 to vector<4x16x1xf32>
    %15 = arith.divf %13, %14 : vector<4x16x1xf32>
    %16 = vector.broadcast %8 : vector<4x16x1xf32> to vector<4x16x24xf32>
    %17 = arith.subf %0, %16 : vector<4x16x24xf32>
    %cst_9 = arith.constant 9.99999974E-6 : f32
    %18 = vector.broadcast %cst_9 : f32 to vector<4x16x1xf32>
    %19 = arith.addf %15, %18 : vector<4x16x1xf32>
    %20 = math.rsqrt %19 : vector<4x16x1xf32>
    %21 = vector.broadcast %20 : vector<4x16x1xf32> to vector<4x16x24xf32>
    %22 = arith.mulf %17, %21 : vector<4x16x24xf32>
    %23 = vector.shape_cast %2 : vector<24xf32> to vector<1x1x24xf32>
    %24 = vector.broadcast %23 : vector<1x1x24xf32> to vector<4x16x24xf32>
    %25 = arith.mulf %22, %24 : vector<4x16x24xf32>
    %26 = vector.shape_cast %4 : vector<24xf32> to vector<1x1x24xf32>
    %27 = vector.broadcast %26 : vector<1x1x24xf32> to vector<4x16x24xf32>
    %28 = arith.addf %25, %27 : vector<4x16x24xf32>
    %29 = arith.truncf %28 : vector<4x16x24xf32> to vector<4x16x24xbf16>
    %c0_10 = arith.constant 0 : index
    %c0_11 = arith.constant 0 : index
    %30 = vector.load %arg4[%c0_10, %c0_11] : memref<24x32xbf16, #tpu.memory_space<vmem>>, vector<24x32xbf16>
    %31 = vector.shape_cast %30 : vector<24x32xbf16> to vector<1x24x32xbf16>
    %32 = vector.broadcast %31 : vector<1x24x32xbf16> to vector<4x24x32xbf16>
    %cst_12 = arith.constant dense<0.000000e+00> : vector<4x16x32xf32>
    %33 = tpu.matmul %29, %32, %cst_12 {dimension_numbers = #tpu.dot_dimension_numbers<[2], [1], [1], [2], [0, 0, 0, 1, 1, 2], [0], [0]>} : vector<4x16x24xbf16>, vector<4x24x32xbf16>, vector<4x16x32xf32> -> vector<4x16x32xf32>
    %cst_13 = arith.constant 0.353553385 : f32
    %34 = vector.broadcast %cst_13 : f32 to vector<4x16x32xf32>
    %35 = arith.mulf %33, %34 : vector<4x16x32xf32>
    %c0_14 = arith.constant 0 : index
    %c0_15 = arith.constant 0 : index
    %36 = vector.load %arg5[%c0_14, %c0_15] : memref<24x32xbf16, #tpu.memory_space<vmem>>, vector<24x32xbf16>
    %37 = vector.shape_cast %36 : vector<24x32xbf16> to vector<1x24x32xbf16>
    %38 = vector.broadcast %37 : vector<1x24x32xbf16> to vector<4x24x32xbf16>
    %cst_16 = arith.constant dense<0.000000e+00> : vector<4x16x32xf32>
    %39 = tpu.matmul %29, %38, %cst_16 {dimension_numbers = #tpu.dot_dimension_numbers<[2], [1], [1], [2], [0, 0, 0, 1, 1, 2], [0], [0]>} : vector<4x16x24xbf16>, vector<4x24x32xbf16>, vector<4x16x32xf32> -> vector<4x16x32xf32>
    %c0_17 = arith.constant 0 : index
    %c0_18 = arith.constant 0 : index
    %40 = vector.load %arg6[%c0_17, %c0_18] : memref<24x32xbf16, #tpu.memory_space<vmem>>, vector<24x32xbf16>
    %41 = vector.shape_cast %40 : vector<24x32xbf16> to vector<1x24x32xbf16>
    %42 = vector.broadcast %41 : vector<1x24x32xbf16> to vector<4x24x32xbf16>
    %cst_19 = arith.constant dense<0.000000e+00> : vector<4x16x32xf32>
    %43 = tpu.matmul %29, %42, %cst_19 {dimension_numbers = #tpu.dot_dimension_numbers<[2], [1], [1], [2], [0, 0, 0, 1, 1, 2], [0], [0]>} : vector<4x16x24xbf16>, vector<4x24x32xbf16>, vector<4x16x32xf32> -> vector<4x16x32xf32>
    %44 = vector.extract_strided_slice %35 {offsets = [0, 0, 0], sizes = [4, 16, 8], strides = [1, 1, 1]} : vector<4x16x32xf32> to vector<4x16x8xf32>
    %45 = vector.extract_strided_slice %35 {offsets = [0, 0, 8], sizes = [4, 16, 8], strides = [1, 1, 1]} : vector<4x16x32xf32> to vector<4x16x8xf32>
    %46 = vector.extract_strided_slice %35 {offsets = [0, 0, 16], sizes = [4, 16, 8], strides = [1, 1, 1]} : vector<4x16x32xf32> to vector<4x16x8xf32>
    %47 = vector.extract_strided_slice %35 {offsets = [0, 0, 24], sizes = [4, 16, 8], strides = [1, 1, 1]} : vector<4x16x32xf32> to vector<4x16x8xf32>
    %48 = tpu.concatenate %44, %45, %46, %47 in 0 : vector<4x16x8xf32>, vector<4x16x8xf32>, vector<4x16x8xf32>, vector<4x16x8xf32> -> vector<16x16x8xf32>
    %49 = arith.truncf %48 : vector<16x16x8xf32> to vector<16x16x8xbf16>
    %50 = vector.extract_strided_slice %39 {offsets = [0, 0, 0], sizes = [4, 16, 8], strides = [1, 1, 1]} : vector<4x16x32xf32> to vector<4x16x8xf32>
    %51 = vector.extract_strided_slice %39 {offsets = [0, 0, 8], sizes = [4, 16, 8], strides = [1, 1, 1]} : vector<4x16x32xf32> to vector<4x16x8xf32>
    %52 = vector.extract_strided_slice %39 {offsets = [0, 0, 16], sizes = [4, 16, 8], strides = [1, 1, 1]} : vector<4x16x32xf32> to vector<4x16x8xf32>
    %53 = vector.extract_strided_slice %39 {offsets = [0, 0, 24], sizes = [4, 16, 8], strides = [1, 1, 1]} : vector<4x16x32xf32> to vector<4x16x8xf32>
    %54 = tpu.concatenate %50, %51, %52, %53 in 0 : vector<4x16x8xf32>, vector<4x16x8xf32>, vector<4x16x8xf32>, vector<4x16x8xf32> -> vector<16x16x8xf32>
    %55 = arith.truncf %54 : vector<16x16x8xf32> to vector<16x16x8xbf16>
    %56 = vector.extract_strided_slice %43 {offsets = [0, 0, 0], sizes = [4, 16, 8], strides = [1, 1, 1]} : vector<4x16x32xf32> to vector<4x16x8xf32>
    %57 = vector.extract_strided_slice %43 {offsets = [0, 0, 8], sizes = [4, 16, 8], strides = [1, 1, 1]} : vector<4x16x32xf32> to vector<4x16x8xf32>
    %58 = vector.extract_strided_slice %43 {offsets = [0, 0, 16], sizes = [4, 16, 8], strides = [1, 1, 1]} : vector<4x16x32xf32> to vector<4x16x8xf32>
    %59 = vector.extract_strided_slice %43 {offsets = [0, 0, 24], sizes = [4, 16, 8], strides = [1, 1, 1]} : vector<4x16x32xf32> to vector<4x16x8xf32>
    %60 = tpu.concatenate %56, %57, %58, %59 in 0 : vector<4x16x8xf32>, vector<4x16x8xf32>, vector<4x16x8xf32>, vector<4x16x8xf32> -> vector<16x16x8xf32>
    %61 = arith.truncf %60 : vector<16x16x8xf32> to vector<16x16x8xbf16>
    %cst_20 = arith.constant dense<0.000000e+00> : vector<16x16x16xf32>
    %62 = tpu.matmul %49, %55, %cst_20 {dimension_numbers = #tpu.dot_dimension_numbers<[2], [2], [1], [1], [0, 0, 0, 1, 1, 1], [0], [0]>} : vector<16x16x8xbf16>, vector<16x16x8xbf16>, vector<16x16x16xf32> -> vector<16x16x16xf32>
    %c0_21 = arith.constant 0 : index
    %c0_22 = arith.constant 0 : index
    %c0_23 = arith.constant 0 : index
    %63 = vector.load %arg8[%c0_21, %c0_22, %c0_23] : memref<4x16x16xf32, #tpu.memory_space<vmem>>, vector<4x16x16xf32>
    %64 = vector.shape_cast %63 : vector<4x16x16xf32> to vector<4x1x16x16xf32>
    %65 = vector.shape_cast %64 : vector<4x1x16x16xf32> to vector<4x1x16x16xf32>
    %66 = vector.broadcast %65 : vector<4x1x16x16xf32> to vector<4x4x16x16xf32>
    %67 = vector.shape_cast %66 : vector<4x4x16x16xf32> to vector<16x16x16xf32>
    %68 = arith.addf %62, %67 : vector<16x16x16xf32>
    %cst_24 = arith.constant dense<0xFF800000> : vector<16x16xf32>
    %69 = vector.multi_reduction <maximumf>, %68, %cst_24 [2] : vector<16x16x16xf32> to vector<16x16xf32>
    %70 = vector.shape_cast %69 : vector<16x16xf32> to vector<16x16x1xf32>
    %71 = vector.broadcast %70 : vector<16x16x1xf32> to vector<16x16x16xf32>
    %72 = arith.subf %68, %71 : vector<16x16x16xf32>
    %73 = math.exp %72 : vector<16x16x16xf32>
    %cst_25 = arith.constant dense<0.000000e+00> : vector<16x16xf32>
    %74 = vector.multi_reduction <add>, %73, %cst_25 [2] : vector<16x16x16xf32> to vector<16x16xf32>
    %75 = vector.shape_cast %74 : vector<16x16xf32> to vector<16x16x1xf32>
    %76 = tpu.reciprocal %75 {approx = true} : vector<16x16x1xf32> -> vector<16x16x1xf32>
    %77 = vector.broadcast %76 : vector<16x16x1xf32> to vector<16x16x16xf32>
    %78 = arith.mulf %73, %77 : vector<16x16x16xf32>
    %79 = arith.truncf %78 : vector<16x16x16xf32> to vector<16x16x16xbf16>
    %cst_26 = arith.constant dense<0.000000e+00> : vector<16x16x8xf32>
    %80 = tpu.matmul %79, %61, %cst_26 {dimension_numbers = #tpu.dot_dimension_numbers<[2], [1], [1], [2], [0, 0, 0, 1, 1, 2], [0], [0]>} : vector<16x16x16xbf16>, vector<16x16x8xbf16>, vector<16x16x8xf32> -> vector<16x16x8xf32>
    %c0_27 = arith.constant 0 : index
    %c0_28 = arith.constant 0 : index
    %c0_29 = arith.constant 0 : index
    %81 = vector.load %arg7[%c0_27, %c0_28, %c0_29] : memref<4x8x24xbf16, #tpu.memory_space<vmem>>, vector<4x8x24xbf16>
    %82 = vector.shape_cast %81 : vector<4x8x24xbf16> to vector<4x1x8x24xbf16>
    %83 = vector.shape_cast %82 : vector<4x1x8x24xbf16> to vector<4x1x8x24xbf16>
    %84 = vector.broadcast %83 : vector<4x1x8x24xbf16> to vector<4x4x8x24xbf16>
    %85 = vector.shape_cast %84 : vector<4x4x8x24xbf16> to vector<16x8x24xbf16>
    %86 = arith.truncf %80 : vector<16x16x8xf32> to vector<16x16x8xbf16>
    %cst_30 = arith.constant dense<0.000000e+00> : vector<16x16x24xf32>
    %87 = tpu.matmul %86, %85, %cst_30 {dimension_numbers = #tpu.dot_dimension_numbers<[2], [1], [1], [2], [0, 0, 0, 1, 1, 2], [0], [0]>} : vector<16x16x8xbf16>, vector<16x8x24xbf16>, vector<16x16x24xf32> -> vector<16x16x24xf32>
    %88 = vector.extract_strided_slice %87 {offsets = [0, 0, 0], sizes = [4, 16, 24], strides = [1, 1, 1]} : vector<16x16x24xf32> to vector<4x16x24xf32>
    %89 = arith.addf %0, %88 : vector<4x16x24xf32>
    %90 = vector.extract_strided_slice %87 {offsets = [4, 0, 0], sizes = [4, 16, 24], strides = [1, 1, 1]} : vector<16x16x24xf32> to vector<4x16x24xf32>
    %91 = arith.addf %89, %90 : vector<4x16x24xf32>
    %92 = vector.extract_strided_slice %87 {offsets = [8, 0, 0], sizes = [4, 16, 24], strides = [1, 1, 1]} : vector<16x16x24xf32> to vector<4x16x24xf32>
    %93 = arith.addf %91, %92 : vector<4x16x24xf32>
    %94 = vector.extract_strided_slice %87 {offsets = [12, 0, 0], sizes = [4, 16, 24], strides = [1, 1, 1]} : vector<16x16x24xf32> to vector<4x16x24xf32>
    %95 = arith.addf %93, %94 : vector<4x16x24xf32>
    %c0_31 = arith.constant 0 : index
    %c0_32 = arith.constant 0 : index
    %c0_33 = arith.constant 0 : index
    %96 = vector.load %arg9[%c0_31, %c0_32, %c0_33] : memref<4x16x24xf32, #tpu.memory_space<vmem>>, vector<4x16x24xf32>
    tpu.vector_store %arg9[%c0_31, %c0_32, %c0_33], %95 {strides = array<i32>} : memref<4x16x24xf32, #tpu.memory_space<vmem>>, vector<4x16x24xf32>,
    return
  }
  func.func @transform_0(%arg0: i32) -> (i32, i32, i32) {
    %c0_i32 = arith.constant 0 : i32
    %c0_i32_0 = arith.constant 0 : i32
    %c0_i32_1 = arith.constant 0 : i32
    return %arg0, %c0_i32, %c0_i32_0 : i32, i32, i32
  }
  func.func @transform_1(%arg0: i32) -> (i32, i32) {
    %c0_i32 = arith.constant 0 : i32
    %c0_i32_0 = arith.constant 0 : i32
    %c0_i32_1 = arith.constant 0 : i32
    return %c0_i32, %c0_i32_0 : i32, i32
  }
  func.func @transform_2(%arg0: i32) -> (i32, i32) {
    %c0_i32 = arith.constant 0 : i32
    %c0_i32_0 = arith.constant 0 : i32
    %c0_i32_1 = arith.constant 0 : i32
    return %c0_i32, %c0_i32_0 : i32, i32
  }
  func.func @transform_3(%arg0: i32) -> (i32, i32) {
    %c0_i32 = arith.constant 0 : i32
    %c0_i32_0 = arith.constant 0 : i32
    %c0_i32_1 = arith.constant 0 : i32
    return %c0_i32, %c0_i32_0 : i32, i32
  }
  func.func @transform_4(%arg0: i32) -> (i32, i32) {
    %c0_i32 = arith.constant 0 : i32
    %c0_i32_0 = arith.constant 0 : i32
    %c0_i32_1 = arith.constant 0 : i32
    return %c0_i32, %c0_i32_0 : i32, i32
  }
  func.func @transform_5(%arg0: i32) -> (i32, i32) {
    %c0_i32 = arith.constant 0 : i32
    %c0_i32_0 = arith.constant 0 : i32
    %c0_i32_1 = arith.constant 0 : i32
    return %c0_i32, %c0_i32_0 : i32, i32
  }
  func.func @transform_6(%arg0: i32) -> (i32, i32, i32) {
    %c0_i32 = arith.constant 0 : i32
    %c0_i32_0 = arith.constant 0 : i32
    %c0_i32_1 = arith.constant 0 : i32
    %c0_i32_2 = arith.constant 0 : i32
    return %c0_i32, %c0_i32_0, %c0_i32_1 : i32, i32, i32
  }
  func.func @transform_7(%arg0: i32) -> (i32, i32, i32) {
    %c0_i32 = arith.constant 0 : i32
    %c0_i32_0 = arith.constant 0 : i32
    %c0_i32_1 = arith.constant 0 : i32
    %c0_i32_2 = arith.constant 0 : i32
    return %c0_i32, %c0_i32_0, %c0_i32_1 : i32, i32, i32
  }
  func.func @transform_8(%arg0: i32) -> (i32, i32, i32) {
    %c0_i32 = arith.constant 0 : i32
    %c0_i32_0 = arith.constant 0 : i32
    %c0_i32_1 = arith.constant 0 : i32
    return %arg0, %c0_i32, %c0_i32_0 : i32, i32, i32
  }
}

</mosaic_0001>

<bundles_post_ra>
// kernel: tpu_custom_call.1
= control target key start
LH: loop header
LB: loop body
LE: loop exit
PB: predicated region body
PF: predicated region fallthrough
CT: control target
= control target key end

     0   :  { %s6649_s0 = inlined_call_operand.hbm [shape: f32[8,16,24], index: 0, kind: input, shape index: {}]   ;;  %s6650_s1 = inlined_call_operand.vmem [shape: f32[1,24], index: 1, kind: input, shape index: {}]   ;;  %s6651_s2 = inlined_call_operand.vmem [shape: f32[1,24], index: 2, kind: input, shape index: {}]   ;;  %s6652_s3 = inlined_call_operand.hbm [shape: bf16[24,32], index: 3, kind: input, shape index: {}]   ;;  %s6653_s4 = inlined_call_operand.hbm [shape: bf16[24,32], index: 4, kind: input, shape index: {}]   ;;  %s6654_s5 = inlined_call_operand.hbm [shape: bf16[24,32], index: 5, kind: input, shape index: {}]   ;;  %s6655_s6 = inlined_call_operand.hbm [shape: bf16[4,8,24], index: 6, kind: input, shape index: {}]   ;;  %s6656_s7 = inlined_call_operand.hbm [shape: f32[4,16,16], index: 7, kind: input, shape index: {}]   ;;  %s6657_s8 = inlined_call_operand.hbm [shape: f32[8,16,24], index: 8, kind: output, shape index: {}]  }
   0x1   :  { %6664 = sst [smem:[#allocation19_spill]] %s6652_s3 }
   0x2   :  { %6665 = sst [smem:[#allocation20_spill]] %s6653_s4 }
   0x3   :  { %13 = vsyncpa [#allocation3], 0 }
   0x4   :  { %15 = vsyncpa [#allocation3 + $0x1], 0 }
   0x5   :  { %16 = vsyncpa [#allocation6], 0 }
   0x6   :  { %17 = vsyncpa [#allocation9], 0 }
   0x7   :  { %18 = vsyncpa [#allocation12], 0 }
   0x8   :  { %19 = vsyncpa [#allocation4], 0 }
   0x9   :  { %21 = vsyncpa [#allocation4 + $0x1], 0  ;;  %s5500_s27 = smov 0   ;;  %s5502_s28 = smov 0  }
   0xa   :  { %s5504_s29 = smov 0   ;;  %s5506_s30 = smov 0  }
   0xb LB: > { %s5437_s9 = smov [#allocation5]   ;;  %s5521_s11 = sadd.s32 4294967295, %s5435_s30   ;;  %s5435_s30 = sphi %s5506_s30, %s6692_s30   ;;  %s5431_s29 = sphi %s5504_s29, %s6691_s29   ;;  %s5427_s28 = sphi %s5502_s28, %s6690_s28   ;;  %s5423_s27 = sphi %s5500_s27, %s6689_s27  }
   0xc   : > { %s249_s10 = sshll.u32 %s5437_s9, 4  ;;  %p4142_p0 = scmp.ge.s32.totalorder %s5435_s30, 1  ;;  %s250_s10 = int_to_ptr.vmem [resolvable:$true] %s249_s10 }
   0xd   : > { %p6660_p1 = scmp.eq.s32.totalorder %s5521_s11, 0  ;;  %p231_p2 = scmp.lt.s32.totalorder %s5435_s30, 3 }
   0xe   : > { %s5438_s13 = smov [#allocation8]   ;;  %s5439_s16 = smov [#allocation7]  }
   0xf   : > { %p5526_p3 = pnand %p4142_p0, %p231_p2  ;;  %s275_s14 = sshll.u32 %s5438_s13, 4  ;;  %s5539_s14 = int_to_ptr.vmem [resolvable:$true] %s275_s14 }
  0x10   : > { %s262_s17 = sshll.u32 %s5439_s16, 4  ;;  %s5212_s19 = scalar_lea.vmem %s250_s10, 192  ;;  %s5541_s17 = int_to_ptr.vmem [resolvable:$true] %s262_s17 }
  0x11   : > { %s6666_s12 = scalar_select %p5526_p3, 1, 0 }
  0x12   : > { %p4779_p5 = pneg %p5526_p3  ;;  %p5213_p8 = scmp.ne.s32.totalorder %s250_s10, %s5212_s19 }
  0x13   : > { %p5220_p11 = scmp.lt.s32.totalorder %s250_s10, %s250_s10  ;;  %p5221_p12 = scmp.lt.s32.totalorder %s5212_s19, %s5212_s19 }
  0x14   : > { %p5535_p6 = pnand %p4779_p5, %p6660_p1 }
  0x15   : > { %p5222_p13 = por %p5221_p12, %p5220_p11 }
  0x16   : > { %p5545_p7 = pneg %p5535_p6 }
  0x18   : > { %p5215_p9 = pnand %p5213_p8, %p5545_p7 }
  0x1a   : > { %p5216_p10 = pneg %p5215_p9 }
  0x1c   : > { %p5223_p0 = pnand %p5222_p13, %p5216_p10 }
  0x1e   : > { %5226 = shalt.err (!%p5223_p0)
}
  0x1f   : > { %s5440_s20 = smov 64   ;;  %s5441_s21 = smov 4  }
  0x20   : > { %s6669_s3 = sld [smem:[#allocation19_spill]]  ;;  %s5238_s24 = scalar_lea.vmem %s5539_s14, 192 }
  0x21   : > { %p5239_p2 = scmp.ne.s32.totalorder %s5539_s14, %s5238_s24  ;;  %p5246_p9 = scmp.lt.s32.totalorder %s5539_s14, %s5539_s14 }
  0x22   : > { %p5247_p10 = scmp.lt.s32.totalorder %s5238_s24, %s5238_s24 }
  0x23   : > { %p5241_p5 = pnand %p5239_p2, %p5545_p7 }
  0x24   : > { %p5248_p11 = por %p5247_p10, %p5246_p9 }
  0x25   : > { %p5242_p8 = pneg %p5241_p5 }
  0x26   : > { %4782 = dma.hbm_to_vmem [thread:$0]  (!%p5535_p6), %s6669_s3, 192, %s250_s10, [#allocation6], %s5440_s20, %s5440_s20, %s5441_s21  }
  0x27   : > { %p5249_p12 = pnand %p5248_p11, %p5242_p8 }
  0x29   : > { %5252 = shalt.err (!%p5249_p12)
}
  0x2a   : > { %4788 = dma.hbm_to_vmem [thread:$0]  (!%p5535_p6), %s6654_s5, 192, %s5539_s14, [#allocation9], %s5440_s20, %s5440_s20, %s5441_s21  }
  0x2b   : > { %s5264_s9 = scalar_lea.vmem %s5541_s17, 192  ;;  %p5272_p5 = scmp.lt.s32.totalorder %s5541_s17, %s5541_s17 }
  0x2c   : > { %p5265_p13 = scmp.ne.s32.totalorder %s5541_s17, %s5264_s9  ;;  %p5273_p8 = scmp.lt.s32.totalorder %s5264_s9, %s5264_s9 }
  0x2e   : > { %p5267_p0 = pnand %p5265_p13, %p5545_p7  ;;  %p5274_p9 = por %p5273_p8, %p5272_p5 }
  0x30   : > { %p5268_p2 = pneg %p5267_p0 }
  0x32   : > { %p5275_p10 = pnand %p5274_p9, %p5268_p2 }
  0x34   : > { %5278 = shalt.err (!%p5275_p10)
}
  0x35   : > { %s6670_s4 = sld [smem:[#allocation20_spill]]  ;;  %s5442_s14 = smov [#allocation10]  }
  0x36   : > { %s288_s16 = sshll.u32 %s5442_s14, 4  ;;  %s5443_s19 = smov [#allocation11]   ;;  %s289_s16 = int_to_ptr.vmem [resolvable:$true] %s288_s16 }
  0x37   : > { %s301_s22 = sshll.u32 %s5443_s19, 4  ;;  %s5290_s23 = scalar_lea.vmem %s289_s16, 256  ;;  %s302_s22 = int_to_ptr.vmem [resolvable:$true] %s301_s22 }
  0x38   : > { %p5291_p11 = scmp.ne.s32.totalorder %s289_s16, %s5290_s23  ;;  %p5298_p0 = scmp.lt.s32.totalorder %s289_s16, %s289_s16 }
  0x39   : > { %p5299_p2 = scmp.lt.s32.totalorder %s5290_s23, %s5290_s23 }
  0x3a   : > { %p5293_p12 = pnand %p5291_p11, %p5545_p7 }
  0x3b   : > { %4785 = dma.hbm_to_vmem [thread:$0]  (!%p5535_p6), %s6670_s4, 192, %s5541_s17, [#allocation6], %s5440_s20, %s5440_s20, %s5441_s21  }
  0x3c   : > { %p5294_p13 = pneg %p5293_p12  ;;  %p5300_p5 = por %p5299_p2, %p5298_p0 }
  0x3e   : > { %p5301_p8 = pnand %p5300_p5, %p5294_p13 }
  0x40   : > { %5304 = shalt.err (!%p5301_p8)
}
  0x41   : > { %4791 = dma.hbm_to_vmem [thread:$0]  (!%p5535_p6), %s6655_s6, 256, %s289_s16, [#allocation9], %s5440_s20, %s5440_s20, %s5441_s21  }
  0x42   : > { %s5316_s25 = scalar_lea.vmem %s302_s22, 1024  ;;  %p5324_p12 = scmp.lt.s32.totalorder %s302_s22, %s302_s22 }
  0x43   : > { %p5317_p9 = scmp.ne.s32.totalorder %s302_s22, %s5316_s25  ;;  %p5325_p0 = scmp.lt.s32.totalorder %s5316_s25, %s5316_s25 }
  0x45   : > { %p5319_p10 = pnand %p5317_p9, %p5545_p7  ;;  %p5326_p13 = por %p5325_p0, %p5324_p12 }
  0x47   : > { %p5320_p11 = pneg %p5319_p10 }
  0x49   : > { %p5327_p2 = pnand %p5326_p13, %p5320_p11 }
  0x4b   : > { %5330 = shalt.err (!%p5327_p2)
}
  0x4c   : > { %s6658_s26 = smov 128   ;;  %s6659_s18 = smov 8  }
  0x4d   : > { %4794 = dma.hbm_to_vmem [thread:$0]  (!%p5535_p6), %s6656_s7, 1024, %s302_s22, [#allocation12], %s6658_s26, %s6658_s26, %s6659_s18  }
  0x4e   : > { %s4141_s9 = sadd.s32 4294967294, %s5435_s30   ;;  %s5611_s10 = sadd.s32 1, %s5435_s30  }
  0x4f   : > { %s34_s13 = sadd.s32 1, %s5431_s29  ;;  %s31_s14 = ssub.s32 %s5435_s30, %s5611_s10 }
  0x50   : > { %p41_p7 = scmp.ne.s32.totalorder %s5431_s29, %s5427_s28  ;;  %p32_p5 = scmp.eq.s32.totalorder %s31_s14, 0 }
  0x51   : > { %p42_p8 = scmp.eq.s32.totalorder %s5435_s30, 0  ;;  %p47_p9 = scmp.ne.s32.totalorder %s5427_s28, %s5423_s27 }
  0x52   : > { %p218_p10 = scmp.eq.s32.totalorder %s5521_s11, 1  ;;  %p224_p0 = scmp.eq.s32.totalorder %s4141_s9, 1 }
  0x53   : > { %s5623_s15 = scalar_select %p32_p5, %s5431_s29, %s34_s13  }
  0x54   : > { %p43_p11 = por %p42_p8, %p41_p7  ;;  %p5627_p12 = por %p6660_p1, %p47_p9 }
  0x55   : > { %p5631_p6 = por %p218_p10, %p41_p7  ;;  %p4808_p13 = scmp.lt.s32.totalorder %s5435_s30, 2 }
  0x56   : > { %s6671_s16 = scalar_select %p5627_p12, 1, 0 }
  0x57   : > { %s6672_s19 = scalar_select %p5631_p6, 1, 0 }
  0x58   : > { %s315_s22 = sand.u32 1, %s5431_s29   ;;  %p5637_p2 = por %p224_p0, %p47_p9 }
  0x59   : > { %s4149_s17 = sshll.u32 %s315_s22, 6  ;;  %s4236_s24 = sshll.u32 %s5435_s30, 10 }
  0x5a   : > { %s6673_s23 = scalar_select %p5637_p2, 1, 0 }
  0x5b   : > { %s5645_s21 = scalar_lea.hbm %s6649_s0, %s4236_s24  ;;  %s319_s13 = scalar_lea.vmem [#allocation2], %s4149_s17 }
  0x5c   : > { %s327_s14 = sshll.u32 %s319_s13, 4  ;;  %p5647_p7 = pnand %p4808_p13, %p43_p11  ;;  %s5651_s14 = int_to_ptr.vmem [resolvable:$true] %s327_s14 }
  0x5d   : > { %s5653_s26 = scalar_lea.sflag [#allocation3], %s315_s22  ;;  %s5331_s18 = scalar_lea.hbm %s5645_s21, 1024 }
  0x5e   : > { %p5332_p5 = scmp.ne.s32.totalorder %s5645_s21, %s5331_s18  ;;  %p5333_p8 = pneg %p5647_p7 }
  0x5f   : > { %s5336_s17 = scalar_lea.hbm %s6649_s0, 2048  ;;  %p5337_p11 = scmp.lt.s32.totalorder %s5645_s21, %s6649_s0 }
  0x60   : > { %p5334_p9 = pnand %p5333_p8, %p5332_p5  ;;  %p5338_p0 = scmp.lt.s32.totalorder %s5336_s17, %s5331_s18 }
  0x62   : > { %p5335_p10 = pneg %p5334_p9  ;;  %p5339_p13 = por %p5338_p0, %p5337_p11 }
  0x64   : > { %p5340_p4 = pnand %p5339_p13, %p5335_p10 }
  0x66   : > { %5343 = shalt.err (!%p5340_p4)
}
  0x67   : > { %s5344_s22 = scalar_lea.vmem %s5651_s14, 1024  ;;  %s5446_s3 = smov [#allocation2]  }
  0x68   : > { %p5345_p1 = scmp.ne.s32.totalorder %s5651_s14, %s5344_s22  ;;  %s5349_s4 = sshll.u32 %s5446_s3, 4  ;;  %s5350_s4 = int_to_ptr.vmem [resolvable:$false] %s5349_s4 }
  0x69   : > { %s5351_s24 = scalar_lea.vmem %s5350_s4, 2048  ;;  %p5352_p9 = scmp.lt.s32.totalorder %s5651_s14, %s5350_s4 }
  0x6a   : > { %p5347_p2 = pnand %p5345_p1, %p5333_p8  ;;  %p5353_p6 = scmp.lt.s32.totalorder %s5351_s24, %s5344_s22 }
  0x6c   : > { %p5348_p5 = pneg %p5347_p2  ;;  %p5354_p12 = por %p5353_p6, %p5352_p9 }
  0x6e   : > { %p5355_p3 = pnand %p5354_p12, %p5348_p5 }
  0x70   : > { %5358 = shalt.err (!%p5355_p3)
}
  0x71   : > { %s6675_s18 = smov 8   ;;  %s6676_s25 = smov 128  }
  0x72   : > { %4798 = dma.hbm_to_vmem [thread:$0]  (!%p5647_p7), %s5645_s21, 1024, %s5651_s14, %s5653_s26, %s6676_s25, %s6676_s25, %s6675_s18  }
  0x73   : > { %p6677_p1 = scmp.ne.s32.totalorder %s6666_s12, 0 }
  0x74   : > { %s5680_s3 = sand.u32 (!%p6677_p1), 1, %s5427_s28   ;;  %p6678_p3 = scmp.ne.s32.totalorder (!%p6677_p1), %s6671_s16, 0 }
  0x75   : > { %339 = sbr.rel (%p6677_p1) target bundleno = 1762 (0x6e2), region = 52  ;;  %s4154_s4 = sshll.u32 (!%p6677_p1), %s5680_s3, 6 }
  0x76   : > { %s342_s17 = scalar_lea.sflag (!%p6677_p1), [#allocation3], %s5680_s3  ;;  %s5686_s9 = scalar_lea.vmem (!%p6677_p1), [#allocation2], %s4154_s4 }
  0x7a   : > { %5402 = dma.done.wait (%p6678_p3), %s342_s17, 1024  }
  0x7b   : > { %5404 = vsyncadd (%p6678_p3), %s342_s17, 4294966272  ;;  %p6679_p4 = scmp.eq.s32.totalorder %s5521_s11, 0 }
  0x7d   : > { %5406 = dma.done.wait (%p6679_p4), [#allocation6], 384   ;;  %p6680_p12 = pmov %p6679_p4 }
  0x7e   : > { %p6681_p6 = pmov %p6679_p4 }
  0x7f   : > { %5408 = vsyncadd (%p6680_p12), [#allocation6], 4294966912 }
  0x80   : > { %5410 = dma.done.wait (%p6681_p6), [#allocation9], 448   ;;  %p6682_p2 = pmov %p6679_p4 }
  0x82   : > { %5412 = vsyncadd (%p6682_p2), [#allocation9], 4294966848  ;;  %p6683_p7 = pmov %p6682_p2 }
  0x83   : > { %p6684_p8 = pmov %p6682_p2 }
  0x84   : > { %5414 = dma.done.wait (%p6683_p7), [#allocation12], 1024  }
  0x85   : > { %5416 = vsyncadd (%p6684_p8), [#allocation12], 4294966272  ;;  %vm411_vm0 = vcmask 195584   ;;  %v401_v0 = vld [vmem:[%s5686_s9] sm:$0xff]  ;;  %v403_v1 = vld [vmem:[%s5686_s9 + $0x10] sm:$0xff]  ;;  %vm564_vm1 = vcmask 1043456  }
  0x86   : > { %v402_v2 = vld [vmem:[%s5686_s9 + $0x8] sm:$0xff]  ;;  %v412_v3 = vsel %vm411_vm0, %v401_v0, 0.0  ;;  %v418_v4 = vsel %vm411_vm0, %v403_v1, 0.0  ;;  %v404_v5 = vld [vmem:[%s5686_s9 + $0x18] sm:$0xff]  ;;  %v405_v7 = vld [vmem:[%s5686_s9 + $0x20] sm:$0xff]  ;;  %v5447_v57 = vmov 0.0  }
  0x87   : > { %413 = vadd.xlane.f32.xlu0 %v412_v3  ;;  %419 = vadd.xlane.f32.xlu1 %v418_v4  ;;  %v415_v6 = vsel %vm411_vm0, %v402_v2, 0.0  ;;  %v421_v8 = vsel %vm411_vm0, %v404_v5, 0.0  ;;  %v406_v9 = vld [vmem:[%s5686_s9 + $0x28] sm:$0xff]  ;;  %v424_v10 = vsel %vm411_vm0, %v405_v7, 0.0  ;;  %v407_v12 = vld [vmem:[%s5686_s9 + $0x30] sm:$0xff]  ;;  %v408_v13 = vld [vmem:[%s5686_s9 + $0x38] sm:$0xff] }
  0x88   : > { %v427_v11 = vsel %vm411_vm0, %v406_v9, 0.0  ;;  %v430_v14 = vsel %vm411_vm0, %v407_v12, 0.0  ;;  %v433_v15 = vsel %vm411_vm0, %v408_v13, 0.0  ;;  %v5043_v56 = vld [vmem:[#allocation5 + $0x8] ss:$0 sps:$4 sm:$0xff]   ;;  %4371 = vmatprep.subr.bf16.mxu0 %v5447_v57  ;;  %4379 = vmatprep.subr.bf16.mxu1 %v5447_v57  ;;  %v5769_v59 = vld [vmem:[#allocation5] sm:$0xff]  }
  0x89   : > { %v5762_v58 = vsel %vm564_vm1, %v5043_v56, 0  ;;  %vm5448_vm2 = vmmov 0   ;;  %s5449_s14 = smov 120   ;;  %vm1403_vm3 = vcmask 64512   ;;  %s5450_s20 = smov 112   ;;  %vm2156_vm4 = vcmask 130048  }
  0x8a   : > { %4372 = vmatpush3.bf16.msra.mxu0 %v5762_v58  ;;  %4380 = vmatpush3.bf16.msra.mxu1 %v5762_v58  ;;  %s5451_s13 = smov 104   ;;  %s6573_s22 = scalar_lea.vmem [#allocation13], %s4154_s4 }
  0x8b   : > { %416 = vadd.xlane.f32.xlu0 %v415_v6  ;;  %422 = vadd.xlane.f32.xlu1 %v421_v8  ;;  %s4238_s24 = sshll.u32 %s5521_s11, 10  ;;  %s4020_s18 = sshll.u32 %s6573_s22, 4  ;;  %s6602_s18 = int_to_ptr.vmem [resolvable:$true] %s4020_s18 }
  0x8c   : > { %4373 = vmatprep.subr.bf16.mxu0 %v5447_v57  ;;  %4381 = vmatprep.subr.bf16.mxu1 %v5447_v57  ;;  %s6600_s17 = scalar_lea.hbm %s6657_s8, %s4238_s24  ;;  %s4006_s11 = scalar_lea.sflag [#allocation4], %s5680_s3 }
  0x8d   : > { %4375 = vmatprep.mubr.msk.bf16.mxu0 %vm5448_vm2, %v5447_v57  ;;  %4383 = vmatprep.mubr.msk.bf16.mxu1 %vm5448_vm2, %v5447_v57  ;;  %p6686_p11 = scmp.ne.s32.totalorder %s6672_s19, 0  ;;  %s5452_s12 = smov [#allocation13]  }
  0x8e   : > { %4374 = vmatpush3.bf16.msra.mxu0 %v5769_v59  ;;  %4382 = vmatpush3.bf16.msra.mxu1 %v5769_v59  ;;  %s5363_s26 = sshll.u32 %s5452_s12, 4  ;;  %s5364_s26 = int_to_ptr.vmem [resolvable:$false] %s5363_s26 }
  0x8f   : > { %425 = vadd.xlane.f32.xlu0 %v424_v10  ;;  %428 = vadd.xlane.f32.xlu1 %v427_v11  ;;  %s5365_s16 = scalar_lea.vmem %s5364_s26, 2048  ;;  %p5366_p5 = scmp.lt.s32.totalorder %s6602_s18, %s5364_s26 }
  0x90   : > { %4387 = vmatprep.subr.bf16.mxu0 %v5447_v57  ;;  %4395 = vmatprep.subr.bf16.mxu1 %v5447_v57 }
  0x93   : > { %431 = vadd.xlane.f32.xlu0 %v430_v14  ;;  %434 = vadd.xlane.f32.xlu1 %v433_v15 }
 0x110   : > { %v414_v16 = vpop.xlane.xlu0 %413  ;;  %v420_v17 = vpop.xlane.xlu1 %419 }
 0x111   : > { %v437_v18 = vmul.f32 0.041666668, %v414_v16  ;;  %v439_v19 = vmul.f32 0.041666668, %v420_v17 }
 0x113   : > { %v5720_v20 = vsub.f32 %v401_v0, %v437_v18  ;;  %v5722_v21 = vsub.f32 %v403_v1, %v439_v19 }
 0x114   : > { %v417_v22 = vpop.xlane.xlu0 %416  ;;  %v423_v23 = vpop.xlane.xlu1 %422 }
 0x115   : > { %v438_v24 = vmul.f32 0.041666668, %v417_v22  ;;  %v440_v25 = vmul.f32 0.041666668, %v423_v23  ;;  %v453_v26 = vmul.f32 %v5720_v20, %v5720_v20  ;;  %v455_v27 = vmul.f32 %v5722_v21, %v5722_v21 }
 0x117   : > { %v5728_v28 = vsub.f32 %v402_v2, %v438_v24  ;;  %v5730_v29 = vsub.f32 %v404_v5, %v440_v25  ;;  %v461_v30 = vsel %vm411_vm0, %v453_v26, 0.0  ;;  %v467_v33 = vsel %vm411_vm0, %v455_v27, 0.0  ;;  %v4161_v24 = vld [vmem:[%s6650_s1] ss:$0 sm:$0xff] }
 0x118   : > { %462 = vadd.xlane.f32.xlu0 %v461_v30  ;;  %v426_v31 = vpop.xlane.xlu0 %425  ;;  %v429_v32 = vpop.xlane.xlu1 %428 }
 0x119   : > { %v441_v34 = vmul.f32 0.041666668, %v426_v31  ;;  %v442_v35 = vmul.f32 0.041666668, %v429_v32  ;;  %v454_v36 = vmul.f32 %v5728_v28, %v5728_v28  ;;  %v456_v37 = vmul.f32 %v5730_v29, %v5730_v29  ;;  %v4162_v31 = vld [vmem:[%s6651_s2] ss:$0 sm:$0xff] }
 0x11b   : > { %v5738_v38 = vsub.f32 %v405_v7, %v441_v34  ;;  %v5740_v39 = vsub.f32 %v406_v9, %v442_v35  ;;  %v464_v40 = vsel %vm411_vm0, %v454_v36, 0.0  ;;  %v470_v43 = vsel %vm411_vm0, %v456_v37, 0.0 }
 0x11c   : > { %468 = vadd.xlane.f32.xlu0 %v467_v33  ;;  %465 = vadd.xlane.f32.xlu1 %v464_v40  ;;  %v432_v41 = vpop.xlane.xlu0 %431  ;;  %v435_v42 = vpop.xlane.xlu1 %434 }
 0x11d   : > { %v443_v44 = vmul.f32 0.041666668, %v432_v41  ;;  %v444_v45 = vmul.f32 0.041666668, %v435_v42  ;;  %v457_v46 = vmul.f32 %v5738_v38, %v5738_v38  ;;  %v458_v47 = vmul.f32 %v5740_v39, %v5740_v39 }
 0x11f   : > { %v5748_v48 = vsub.f32 %v407_v12, %v443_v44  ;;  %v5750_v49 = vsub.f32 %v408_v13, %v444_v45  ;;  %v473_v50 = vsel %vm411_vm0, %v457_v46, 0.0  ;;  %v476_v51 = vsel %vm411_vm0, %v458_v47, 0.0 }
 0x120   : > { %471 = vadd.xlane.f32.xlu1 %v470_v43  ;;  %474 = vadd.xlane.f32.xlu0 %v473_v50 }
 0x121   : > { %v459_v52 = vmul.f32 %v5748_v48, %v5748_v48  ;;  %v460_v53 = vmul.f32 %v5750_v49, %v5750_v49 }
 0x123   : > { %v479_v54 = vsel %vm411_vm0, %v459_v52, 0.0  ;;  %v482_v55 = vsel %vm411_vm0, %v460_v53, 0.0 }
 0x124   : > { %477 = vadd.xlane.f32.xlu1 %v476_v51  ;;  %480 = vadd.xlane.f32.xlu0 %v479_v54  ;;  %v5045_v51 = vld [vmem:[#allocation7 + $0x8] ss:$0 sps:$4 sm:$0xff]  }
 0x125   : > { %v762_v56 = vsel %vm564_vm1, %v5045_v51, 0 }
 0x128   : > { %483 = vadd.xlane.f32.xlu1 %v482_v55 }
 0x1a1   : > { %v463_v60 = vpop.xlane.xlu0 %462 }
 0x1a2   : > { %v485_v61 = vmul.f32 0.041666668, %v463_v60 }
 0x1a4   : > { %v493_v62 = vadd.f32 1e-05, %v485_v61 }
 0x1a5   : > { %v466_v63 = vpop.xlane.xlu1 %465  ;;  %v469_v0 = vpop.xlane.xlu0 %468 }
 0x1a6   : > { %5049 = vrsqrt.f32 %v493_v62  ;;  %v486_v1 = vmul.f32 0.041666668, %v466_v63  ;;  %v487_v2 = vmul.f32 0.041666668, %v469_v0  ;;  %v5046_v62 = vld [vmem:[#allocation7] sm:$0xff]   ;;  %v5048_v0 = vld [vmem:[#allocation8] sm:$0xff]  }
 0x1a8   : > { %v494_v3 = vadd.f32 1e-05, %v486_v1  ;;  %v495_v4 = vadd.f32 1e-05, %v487_v2 }
 0x1a9   : > { %v472_v5 = vpop.xlane.xlu1 %471  ;;  %v475_v6 = vpop.xlane.xlu0 %474 }
 0x1aa   : > { %5051 = vrsqrt.f32 %v494_v3  ;;  %v488_v7 = vmul.f32 0.041666668, %v472_v5  ;;  %v489_v8 = vmul.f32 0.041666668, %v475_v6 }
 0x1ab   : > { %5053 = vrsqrt.f32 %v495_v4 }
 0x1ac   : > { %v496_v9 = vadd.f32 1e-05, %v488_v7  ;;  %v497_v10 = vadd.f32 1e-05, %v489_v8 }
 0x1ad   : > { %v478_v11 = vpop.xlane.xlu1 %477  ;;  %v481_v12 = vpop.xlane.xlu0 %480 }
 0x1ae   : > { %5055 = vrsqrt.f32 %v496_v9  ;;  %v490_v13 = vmul.f32 0.041666668, %v478_v11  ;;  %v491_v14 = vmul.f32 0.041666668, %v481_v12 }
 0x1af   : > { %5057 = vrsqrt.f32 %v497_v10 }
 0x1b0   : > { %v498_v15 = vadd.f32 1e-05, %v490_v13  ;;  %v499_v16 = vadd.f32 1e-05, %v491_v14 }
 0x1b1   : > { %v484_v17 = vpop.xlane.xlu1 %483 }
 0x1b2   : > { %5059 = vrsqrt.f32 %v498_v15  ;;  %v492_v18 = vmul.f32 0.041666668, %v484_v17 }
 0x1b3   : > { %v5050_v19 = vpop.eup %5049  ;;  %5061 = vrsqrt.f32 %v499_v16 }
 0x1b4   : > { %v500_v22 = vadd.f32 1e-05, %v492_v18  ;;  %v509_v23 = vmul.f32 %v5050_v19, %v5720_v20 }
 0x1b6   : > { %5063 = vrsqrt.f32 %v500_v22  ;;  %v523_v30 = vmul.f32 %v4161_v24, %v509_v23 }
 0x1b7   : > { %v5052_v25 = vpop.eup %5051 }
 0x1b8   : > { %v5054_v26 = vpop.eup %5053  ;;  %v510_v27 = vmul.f32 %v5052_v25, %v5728_v28  ;;  %v537_v20 = vadd.f32 %v4162_v31, %v523_v30 }
 0x1b9   : > { %v511_v32 = vmul.f32 %v5054_v26, %v5722_v21 }
 0x1ba   : > { %v524_v33 = vmul.f32 %v4161_v24, %v510_v27 }
 0x1bb   : > { %v5056_v34 = vpop.eup %5055  ;;  %v525_v40 = vmul.f32 %v4161_v24, %v511_v32 }
 0x1bc   : > { %v5058_v35 = vpop.eup %5057  ;;  %v538_v36 = vadd.f32 %v4162_v31, %v524_v33  ;;  %v512_v37 = vmul.f32 %v5056_v34, %v5730_v29 }
 0x1bd   : > { %v513_v41 = vmul.f32 %v5058_v35, %v5738_v38  ;;  %v539_v21 = vadd.f32 %v4162_v31, %v525_v40 }
 0x1be   : > { %v5790_v42 = vpack.c.bf16 %v538_v36, %v537_v20  ;;  %v526_v28 = vmul.f32 %v4161_v24, %v512_v37 }
 0x1bf   : > { %v5060_v43 = vpop.eup %5059  ;;  %v527_v47 = vmul.f32 %v4161_v24, %v513_v41 }
 0x1c0   : > { %v5062_v44 = vpop.eup %5061  ;;  %v514_v45 = vmul.f32 %v5060_v43, %v5740_v39  ;;  %4376 = vmatmul.mubr.msk.bf16.vlgmr.msra.gmra.mxu0 %vm411_vm0, %v5790_v42  ;;  %v540_v46 = vadd.f32 %v4162_v31, %v526_v28 }
 0x1c1   : > { %v515_v50 = vmul.f32 %v5062_v44, %v5748_v48  ;;  %4388 = vmatpush3.bf16.msra.mxu0 %v5762_v58  ;;  %4391 = vmatprep.mubr.msk.bf16.mxu0 %vm5448_vm2, %v5447_v57  ;;  %v541_v53 = vadd.f32 %v4162_v31, %v527_v47 }
 0x1c2   : > { %v5799_v29 = vpack.c.bf16 %v540_v46, %v539_v21  ;;  %4389 = vmatprep.subr.bf16.mxu0 %v5447_v57  ;;  %v528_v38 = vmul.f32 %v4161_v24, %v514_v45 }
 0x1c3   : > { %v5064_v39 = vpop.eup %5063  ;;  %v529_v48 = vmul.f32 %v4161_v24, %v515_v50 }
 0x1c4   : > { %v516_v52 = vmul.f32 %v5064_v39, %v5750_v49  ;;  %4384 = vmatmul.mubr.msk.bf16.vlgmr.msra.gmra.mxu1 %vm411_vm0, %v5799_v29  ;;  %v542_v54 = vadd.f32 %v4162_v31, %v528_v38 }
 0x1c5   : > { %4390 = vmatpush3.bf16.msra.mxu0 %v5769_v59  ;;  %4396 = vmatpush3.bf16.msra.mxu1 %v5762_v58  ;;  %v543_v49 = vadd.f32 %v4162_v31, %v529_v48 }
 0x1c6   : > { %v547_v55 = vpack.c.bf16 %v542_v54, %v541_v53  ;;  %4397 = vmatprep.subr.bf16.mxu1 %v5447_v57  ;;  %4403 = vmatprep.subr.bf16.mxu0 %v5447_v57  ;;  %v530_v60 = vmul.f32 %v4161_v24, %v516_v52 }
 0x1c7   : > { %4399 = vmatprep.mubr.msk.bf16.mxu1 %vm5448_vm2, %v5447_v57 }
 0x1c8   : > { %4392 = vmatmul.mubr.msk.bf16.vlgmr.msra.gmra.mxu0 %vm411_vm0, %v547_v55  ;;  %v544_v61 = vadd.f32 %v4162_v31, %v530_v60 }
 0x1c9   : > { %4398 = vmatpush3.bf16.msra.mxu1 %v5769_v59  ;;  %4404 = vmatpush3.bf16.msra.mxu0 %v762_v56  ;;  %v5047_v59 = vld [vmem:[#allocation8 + $0x8] ss:$0 sps:$4 sm:$0xff]  }
 0x1ca   : > { %v548_v58 = vpack.c.bf16 %v544_v61, %v543_v49  ;;  %4405 = vmatprep.subr.bf16.mxu0 %v5447_v57  ;;  %4411 = vmatprep.subr.bf16.mxu1 %v5447_v57  ;;  %v941_v63 = vsel %vm564_vm1, %v5047_v59, 0 }
 0x1cb   : > { %4407 = vmatprep.mubr.msk.bf16.mxu0 %vm5448_vm2, %v5447_v57 }
 0x1cc   : > { %4400 = vmatmul.mubr.msk.bf16.vlgmr.msra.gmra.mxu1 %vm411_vm0, %v548_v58 }
 0x1cd   : > { %4406 = vmatpush3.bf16.msra.mxu0 %v5046_v62  ;;  %4412 = vmatpush3.bf16.msra.mxu1 %v762_v56 }
 0x1ce   : > { %4413 = vmatprep.subr.bf16.mxu1 %v5447_v57  ;;  %4419 = vmatprep.subr.bf16.mxu0 %v5447_v57 }
 0x1cf   : > { %4415 = vmatprep.mubr.msk.bf16.mxu1 %vm5448_vm2, %v5447_v57 }
 0x1d0   : > { %4408 = vmatmul.mubr.msk.bf16.vlgmr.msra.gmra.mxu0 %vm411_vm0, %v5790_v42 }
 0x1d1   : > { %4414 = vmatpush3.bf16.msra.mxu1 %v5046_v62  ;;  %4420 = vmatpush3.bf16.msra.mxu0 %v762_v56 }
 0x1d2   : > { %4421 = vmatprep.subr.bf16.mxu0 %v5447_v57  ;;  %4427 = vmatprep.subr.bf16.mxu1 %v5447_v57 }
 0x1d3   : > { %4423 = vmatprep.mubr.msk.bf16.mxu0 %vm5448_vm2, %v5447_v57 }
 0x1d4   : > { %4416 = vmatmul.mubr.msk.bf16.vlgmr.msra.gmra.mxu1 %vm411_vm0, %v5799_v29 }
 0x1d5   : > { %4422 = vmatpush3.bf16.msra.mxu0 %v5046_v62  ;;  %4428 = vmatpush3.bf16.msra.mxu1 %v762_v56 }
 0x1d6   : > { %4429 = vmatprep.subr.bf16.mxu1 %v5447_v57  ;;  %4435 = vmatprep.subr.bf16.mxu0 %v5447_v57 }
 0x1d7   : > { %4431 = vmatprep.mubr.msk.bf16.mxu1 %vm5448_vm2, %v5447_v57 }
 0x1d8   : > { %4424 = vmatmul.mubr.msk.bf16.vlgmr.msra.gmra.mxu0 %vm411_vm0, %v547_v55 }
 0x1d9   : > { %4430 = vmatpush3.bf16.msra.mxu1 %v5046_v62  ;;  %4436 = vmatpush3.bf16.msra.mxu0 %v941_v63 }
 0x1da   : > { %4437 = vmatprep.subr.bf16.mxu0 %v5447_v57  ;;  %4443 = vmatprep.subr.bf16.mxu1 %v5447_v57 }
 0x1db   : > { %4439 = vmatprep.mubr.msk.bf16.mxu0 %vm5448_vm2, %v5447_v57 }
 0x1dc   : > { %4432 = vmatmul.mubr.msk.bf16.vlgmr.msra.gmra.mxu1 %vm411_vm0, %v548_v58 }
 0x1dd   : > { %4438 = vmatpush3.bf16.msra.mxu0 %v5048_v0  ;;  %4444 = vmatpush3.bf16.msra.mxu1 %v941_v63 }
 0x1de   : > { %4445 = vmatprep.subr.bf16.mxu1 %v5447_v57  ;;  %4451 = vmatprep.subr.bf16.mxu0 %v5447_v57 }
 0x1df   : > { %4447 = vmatprep.mubr.msk.bf16.mxu1 %vm5448_vm2, %v5447_v57 }
 0x1e0   : > { %4440 = vmatmul.mubr.msk.bf16.vlgmr.msra.gmra.mxu0 %vm411_vm0, %v5790_v42 }
 0x1e1   : > { %4446 = vmatpush3.bf16.msra.mxu1 %v5048_v0  ;;  %4452 = vmatpush3.bf16.msra.mxu0 %v941_v63 }
 0x1e2   : > { %4453 = vmatprep.subr.bf16.mxu0 %v5447_v57  ;;  %4459 = vmatprep.subr.bf16.mxu1 %v5447_v57 }
 0x1e3   : > { %4455 = vmatprep.mubr.msk.bf16.mxu0 %vm5448_vm2, %v5447_v57 }
 0x1e4   : > { %4448 = vmatmul.mubr.msk.bf16.vlgmr.msra.gmra.mxu1 %vm411_vm0, %v5799_v29 }
 0x1e5   : > { %4454 = vmatpush3.bf16.msra.mxu0 %v5048_v0  ;;  %4460 = vmatpush3.bf16.msra.mxu1 %v941_v63 }
 0x1e6   : > { %4461 = vmatprep.subr.bf16.mxu1 %v5447_v57  ;;  %4463 = vmatprep.mubr.msk.bf16.mxu1 %vm5448_vm2, %v5447_v57 }
 0x1e7   : > { %4467 = vmatprep.subr.bf16.mxu0 %v5447_v57 }
 0x1e8   : > { %4456 = vmatmul.mubr.msk.bf16.vlgmr.msra.gmra.mxu0 %vm411_vm0, %v547_v55 }
 0x1e9   : > { %4462 = vmatpush3.bf16.msra.mxu1 %v5048_v0  ;;  %4469 = vmatprep.mubr.msk.bf16.mxu0 %vm5448_vm2, %v5447_v57 }
 0x1ea   : > { %4473 = vmatprep.subr.bf16.mxu1 %v5447_v57 }
 0x1ec   : > { %4464 = vmatmul.mubr.msk.bf16.vlgmr.msra.gmra.mxu1 %vm411_vm0, %v548_v58 }
 0x1ed   : > { %4475 = vmatprep.mubr.msk.bf16.mxu1 %vm5448_vm2, %v5447_v57 }
 0x280   : > { %v602_v1 = vpop.f32.mrf.mxu0 }
 0x281   : > { %v741_v5 = vmul.f32 0.35355338, %v602_v1 }
 0x282   : > { %v4377_v2 = vpop.f32.mrf.mxu0 }
 0x284   : > { %v605_v3 = vpop.f32.mrf.mxu0  ;;  %v646_v4 = vpop.f32.mrf.mxu1 }
 0x285   : > { %v742_v6 = vmul.f32 0.35355338, %v605_v3  ;;  %v743_v42 = vmul.f32 0.35355338, %v646_v4 }
 0x286   : > { %v4378_v7 = vpop.f32.mrf.mxu0  ;;  %v4385_v8 = vpop.f32.mrf.mxu1 }
 0x287   : > { %v5865_v9 = vpack.i.bf16 %v742_v6, %v741_v5  ;;  %v1187_v44 = vpack.c.bf16 %v742_v6, %v741_v5 }
 0x288   : > { %v649_v10 = vpop.f32.mrf.mxu1  ;;  %v690_v11 = vpop.f32.mrf.mxu0 }
 0x289   : > { %4869 = vrot.lane.b32.xlu1 %v5865_v9, %s5449_s14  ;;  %v744_v36 = vmul.f32 0.35355338, %v649_v10  ;;  %v745_v38 = vmul.f32 0.35355338, %v690_v11 }
 0x28a   : > { %v4386_v12 = vpop.f32.mrf.mxu1  ;;  %v4393_v13 = vpop.f32.mrf.mxu0 }
 0x28b   : > { %v5883_v29 = vpack.i.bf16 %v744_v36, %v743_v42  ;;  %v1188_v53 = vpack.c.bf16 %v744_v36, %v743_v42 }
 0x28c   : > { %v693_v14 = vpop.f32.mrf.mxu0  ;;  %v734_v15 = vpop.f32.mrf.mxu1 }
 0x28d   : > { %v746_v45 = vmul.f32 0.35355338, %v693_v14  ;;  %v747_v62 = vmul.f32 0.35355338, %v734_v15 }
 0x28e   : > { %v4394_v16 = vpop.f32.mrf.mxu0  ;;  %v4401_v17 = vpop.f32.mrf.mxu1 }
 0x28f   : > { %v4888_v54 = vpack.i.bf16 %v746_v45, %v745_v38  ;;  %v1189_v63 = vpack.c.bf16 %v746_v45, %v745_v38 }
 0x290   : > { %v737_v18 = vpop.f32.mrf.mxu1  ;;  %v798_v19 = vpop.f32.mrf.mxu0 }
 0x291   : > { %v748_v56 = vmul.f32 0.35355338, %v737_v18 }
 0x292   : > { %v4402_v22 = vpop.f32.mrf.mxu1  ;;  %v4409_v23 = vpop.f32.mrf.mxu0 }
 0x293   : > { %v4898_v3 = vpack.i.bf16 %v748_v56, %v747_v62  ;;  %v1190_v7 = vpack.c.bf16 %v748_v56, %v747_v62 }
 0x294   : > { %v801_v24 = vpop.f32.mrf.mxu0  ;;  %v839_v25 = vpop.f32.mrf.mxu1 }
 0x295   : > { %v5869_v26 = vpack.i.bf16 %v801_v24, %v798_v19  ;;  %v1283_v27 = vpack.c.bf16 %v801_v24, %v798_v19 }
 0x296   : > { %v4410_v30 = vpop.f32.mrf.mxu0  ;;  %v4417_v31 = vpop.f32.mrf.mxu1 }
 0x297   : > { %4864 = vrot.lane.b32.xlu0 %v5869_v26, %s5449_s14  ;;  %v1408_v32 = vsel %vm1403_vm3, %v1283_v27, 0 }
 0x298   : > { %v842_v33 = vpop.f32.mrf.mxu1  ;;  %v880_v34 = vpop.f32.mrf.mxu0  ;;  %4468 = vmatpush3.bf16.xpose.msra.mxu0 %v1408_v32 }
 0x299   : > { %v5874_v35 = vpack.i.bf16 %v842_v33, %v839_v25  ;;  %v1284_v20 = vpack.c.bf16 %v842_v33, %v839_v25  ;;  %4479 = vmatprep.subr.bf16.mxu0 %v5447_v57 }
 0x29a   : > { %v4418_v37 = vpop.f32.mrf.mxu1  ;;  %v4425_v40 = vpop.f32.mrf.mxu0 }
 0x29b   : > { %4874 = vrot.lane.b32.xlu1 %v5874_v35, %s5449_s14  ;;  %v1455_v41 = vsel %vm1403_vm3, %v1284_v20, 0 }
 0x29c   : > { %v883_v28 = vpop.f32.mrf.mxu0  ;;  %v921_v43 = vpop.f32.mrf.mxu1  ;;  %4474 = vmatpush3.bf16.xpose.msra.mxu1 %v1455_v41 }
 0x29d   : > { %v5880_v21 = vpack.i.bf16 %v883_v28, %v880_v34  ;;  %v1285_v46 = vpack.c.bf16 %v883_v28, %v880_v34  ;;  %4485 = vmatprep.subr.bf16.mxu1 %v5447_v57 }
 0x29e   : > { %v4426_v47 = vpop.f32.mrf.mxu0  ;;  %v4433_v50 = vpop.f32.mrf.mxu1 }
 0x29f   : > { %4470 = vmatmul.mubr.msk.bf16.vlgmr.msra.gmra.mxu0 %vm1403_vm3, %v1187_v44  ;;  %4884 = vrot.lane.b32.xlu0 %v5880_v21, %s5449_s14  ;;  %v1502_v51 = vsel %vm1403_vm3, %v1285_v46, 0 }
 0x2a0   : > { %4879 = vrot.lane.b32.xlu1 %v5883_v29, %s5449_s14  ;;  %v924_v39 = vpop.f32.mrf.mxu1  ;;  %v5891_v52 = vpop.f32.mrf.mxu0  ;;  %4480 = vmatpush3.bf16.xpose.msra.mxu0 %v1502_v51 }
 0x2a1   : > { %v4893_v48 = vpack.i.bf16 %v924_v39, %v921_v43  ;;  %v1286_v55 = vpack.c.bf16 %v924_v39, %v921_v43  ;;  %4481 = vmatprep.mubr.msk.bf16.mxu0 %vm5448_vm2, %v5447_v57  ;;  %4491 = vmatprep.subr.bf16.mxu0 %v5447_v57 }
 0x2a2   : > { %v4434_v60 = vpop.f32.mrf.mxu1  ;;  %v4441_v49 = vpop.f32.mrf.mxu0 }
 0x2a3   : > { %4889 = vrot.lane.b32.xlu0 %v4888_v54, %s5449_s14  ;;  %4476 = vmatmul.mubr.msk.bf16.vlgmr.msra.gmra.mxu1 %vm1403_vm3, %v1188_v53  ;;  %v1549_v61 = vsel %vm1403_vm3, %v1286_v55, 0 }
 0x2a4   : > { %4894 = vrot.lane.b32.xlu1 %v4893_v48, %s5449_s14  ;;  %v5900_v58 = vpop.f32.mrf.mxu0  ;;  %v5902_v59 = vpop.f32.mrf.mxu1  ;;  %4486 = vmatpush3.bf16.xpose.msra.mxu1 %v1549_v61 }
 0x2a5   : > { %v1379_v0 = vpack.c.bf16 %v5900_v58, %v5891_v52  ;;  %4487 = vmatprep.mubr.msk.bf16.mxu1 %vm5448_vm2, %v5447_v57  ;;  %4497 = vmatprep.subr.bf16.mxu1 %v5447_v57  ;;  %v5911_v4 = vpack.i.bf16 %v5900_v58, %v5891_v52 }
 0x2a6   : > { %v4442_v1 = vpop.f32.mrf.mxu0  ;;  %v4449_v2 = vpop.f32.mrf.mxu1 }
 0x2a7   : > { %4904 = vrot.lane.b32.xlu0 %v5869_v26, %s5450_s20  ;;  %4482 = vmatmul.mubr.msk.bf16.vlgmr.msra.gmra.mxu0 %vm1403_vm3, %v1189_v63 }
 0x2a8   : > { %4899 = vrot.lane.b32.xlu1 %v4898_v3, %s5449_s14  ;;  %v5917_v5 = vpop.f32.mrf.mxu1  ;;  %v5919_v6 = vpop.f32.mrf.mxu0  ;;  %4493 = vmatprep.mubr.msk.bf16.mxu0 %vm5448_vm2, %v5447_v57 }
 0x2a9   : > { %v1380_v8 = vpack.c.bf16 %v5917_v5, %v5902_v59  ;;  %v5927_v10 = vpack.i.bf16 %v5917_v5, %v5902_v59 }
 0x2aa   : > { %v4450_v11 = vpop.f32.mrf.mxu1  ;;  %v4457_v12 = vpop.f32.mrf.mxu0 }
 0x2ab   : > { %4914 = vrot.lane.b32.xlu0 %v5865_v9, %s5450_s20  ;;  %4488 = vmatmul.mubr.msk.bf16.vlgmr.msra.gmra.mxu1 %vm1403_vm3, %v1190_v7 }
 0x2ac   : > { %4909 = vrot.lane.b32.xlu1 %v5874_v35, %s5450_s20  ;;  %v5934_v13 = vpop.f32.mrf.mxu0  ;;  %v5936_v14 = vpop.f32.mrf.mxu1  ;;  %4499 = vmatprep.mubr.msk.bf16.mxu1 %vm5448_vm2, %v5447_v57 }
 0x2ad   : > { %v5942_v15 = vpack.i.bf16 %v5934_v13, %v5919_v6  ;;  %v1381_v16 = vpack.c.bf16 %v5934_v13, %v5919_v6 }
 0x2ae   : > { %v4458_v17 = vpop.f32.mrf.mxu0  ;;  %v4465_v18 = vpop.f32.mrf.mxu1 }
 0x2af   : > { %4924 = vrot.lane.b32.xlu0 %v5880_v21, %s5450_s20 }
 0x2b0   : > { %4919 = vrot.lane.b32.xlu1 %v5883_v29, %s5450_s20  ;;  %v5950_v19 = vpop.f32.mrf.mxu1 }
 0x2b1   : > { %v5954_v22 = vpack.i.bf16 %v5950_v19, %v5936_v14  ;;  %v6685_v6 = vpack.c.bf16 %v5950_v19, %v5936_v14 }
 0x2b2   : > { %v4466_v24 = vpop.f32.mrf.mxu1 }
 0x2b3   : > { %4929 = vrot.lane.b32.xlu0 %v4888_v54, %s5450_s20 }
 0x2b4   : > { %4934 = vrot.lane.b32.xlu1 %v4893_v48, %s5450_s20 }
 0x2b7   : > { %4944 = vrot.lane.b32.xlu0 %v5869_v26, %s5451_s13 }
 0x2b8   : > { %4939 = vrot.lane.b32.xlu1 %v4898_v3, %s5450_s20 }
 0x2bb   : > { %4954 = vrot.lane.b32.xlu0 %v5865_v9, %s5451_s13 }
 0x2bc   : > { %4949 = vrot.lane.b32.xlu1 %v5874_v35, %s5451_s13 }
 0x2bf   : > { %4964 = vrot.lane.b32.xlu0 %v5880_v21, %s5451_s13 }
 0x2c0   : > { %4959 = vrot.lane.b32.xlu1 %v5883_v29, %s5451_s13 }
 0x2c3   : > { %4974 = vrot.lane.b32.xlu0 %v4888_v54, %s5451_s13 }
 0x2c4   : > { %4969 = vrot.lane.b32.xlu1 %v4893_v48, %s5451_s13 }
 0x2c7   : > { %4984 = vrot.lane.b32.xlu0 %v5911_v4, %s5449_s14 }
 0x2c8   : > { %4979 = vrot.lane.b32.xlu1 %v4898_v3, %s5451_s13 }
 0x2cb   : > { %4994 = vrot.lane.b32.xlu0 %v5911_v4, %s5450_s20 }
 0x2cc   : > { %4989 = vrot.lane.b32.xlu1 %v5927_v10, %s5449_s14 }
 0x2cf   : > { %5004 = vrot.lane.b32.xlu0 %v5942_v15, %s5449_s14 }
 0x2d0   : > { %4999 = vrot.lane.b32.xlu1 %v5927_v10, %s5450_s20 }
 0x2d4   : > { %5009 = vrot.lane.b32.xlu1 %v5954_v22, %s5449_s14 }
 0x2d8   : > { %5014 = vrot.lane.b32.xlu1 %v5942_v15, %s5450_s20 }
 0x2dc   : > { %5019 = vrot.lane.b32.xlu1 %v5954_v22, %s5450_s20 }
 0x2fb   : > { %v4870_v9 = vpop.permute.xlu1 %4869 }
 0x2fc   : > { %v4872_v35 = vunpack.i.h.bf16 %v4870_v9  ;;  %v4871_v20 = vunpack.i.l.bf16 %v4870_v9 }
 0x2fe   : > { %v1191_v43 = vpack.c.bf16 %v4872_v35, %v4871_v20 }
 0x309   : > { %v4865_v25 = vpop.permute.xlu0 %4864 }
 0x30a   : > { %v4867_v26 = vunpack.i.h.bf16 %v4865_v25  ;;  %v4866_v27 = vunpack.i.l.bf16 %v4865_v25 }
 0x30c   : > { %v1287_v30 = vpack.c.bf16 %v4867_v26, %v4866_v27 }
 0x30d   : > { %v4875_v31 = vpop.permute.xlu1 %4874 }
 0x30e   : > { %v4877_v32 = vunpack.i.h.bf16 %v4875_v31  ;;  %v4876_v33 = vunpack.i.l.bf16 %v4875_v31  ;;  %v1596_v34 = vsel %vm1403_vm3, %v1287_v30, 0 }
 0x30f   : > { %4492 = vmatpush3.bf16.xpose.msra.mxu0 %v1596_v34 }
 0x310   : > { %v1288_v36 = vpack.c.bf16 %v4877_v32, %v4876_v33  ;;  %4503 = vmatprep.subr.bf16.mxu0 %v5447_v57 }
 0x311   : > { %v4885_v37 = vpop.permute.xlu0 %4884 }
 0x312   : > { %v4880_v40 = vpop.permute.xlu1 %4879  ;;  %v4887_v41 = vunpack.i.h.bf16 %v4885_v37  ;;  %v4886_v42 = vunpack.i.l.bf16 %v4885_v37  ;;  %v1643_v28 = vsel %vm1403_vm3, %v1288_v36, 0 }
 0x313   : > { %4498 = vmatpush3.bf16.xpose.msra.mxu1 %v1643_v28  ;;  %v4882_v44 = vunpack.i.h.bf16 %v4880_v40  ;;  %v4881_v45 = vunpack.i.l.bf16 %v4880_v40 }
 0x314   : > { %v1289_v21 = vpack.c.bf16 %v4887_v41, %v4886_v42  ;;  %4509 = vmatprep.subr.bf16.mxu1 %v5447_v57 }
 0x315   : > { %v4890_v46 = vpop.permute.xlu0 %4889  ;;  %v1192_v51 = vpack.c.bf16 %v4882_v44, %v4881_v45 }
 0x316   : > { %v4895_v47 = vpop.permute.xlu1 %4894  ;;  %4494 = vmatmul.mubr.msk.bf16.vlgmr.msra.gmra.mxu0 %vm1403_vm3, %v1191_v43  ;;  %v1690_v50 = vsel %vm1403_vm3, %v1289_v21, 0  ;;  %v4892_v39 = vunpack.i.h.bf16 %v4890_v46  ;;  %v4891_v53 = vunpack.i.l.bf16 %v4890_v46 }
 0x317   : > { %v4897_v29 = vunpack.i.h.bf16 %v4895_v47  ;;  %v4896_v38 = vunpack.i.l.bf16 %v4895_v47  ;;  %4504 = vmatpush3.bf16.xpose.msra.mxu0 %v1690_v50  ;;  %4505 = vmatprep.mubr.msk.bf16.mxu0 %vm5448_vm2, %v5447_v57 }
 0x318   : > { %4515 = vmatprep.subr.bf16.mxu0 %v5447_v57  ;;  %v1193_v61 = vpack.c.bf16 %v4892_v39, %v4891_v53 }
 0x319   : > { %v1290_v54 = vpack.c.bf16 %v4897_v29, %v4896_v38  ;;  %v4905_v48 = vpop.permute.xlu0 %4904 }
 0x31a   : > { %v4900_v55 = vpop.permute.xlu1 %4899  ;;  %v4907_v56 = vunpack.i.h.bf16 %v4905_v48  ;;  %v4906_v60 = vunpack.i.l.bf16 %v4905_v48  ;;  %4500 = vmatmul.mubr.msk.bf16.vlgmr.msra.gmra.mxu1 %vm1403_vm3, %v1192_v51 }
 0x31b   : > { %v1737_v49 = vsel %vm1403_vm3, %v1290_v54, 0  ;;  %4511 = vmatprep.mubr.msk.bf16.mxu1 %vm5448_vm2, %v5447_v57  ;;  %v4902_v63 = vunpack.i.h.bf16 %v4900_v55  ;;  %v4901_v1 = vunpack.i.l.bf16 %v4900_v55 }
 0x31c   : > { %v1291_v62 = vpack.c.bf16 %v4907_v56, %v4906_v60  ;;  %4510 = vmatpush3.bf16.xpose.msra.mxu1 %v1737_v49 }
 0x31d   : > { %v4915_v2 = vpop.permute.xlu0 %4914  ;;  %4521 = vmatprep.subr.bf16.mxu1 %v5447_v57  ;;  %v1194_v24 = vpack.c.bf16 %v4902_v63, %v4901_v1 }
 0x31e   : > { %v4910_v3 = vpop.permute.xlu1 %4909  ;;  %4506 = vmatmul.mubr.msk.bf16.vlgmr.msra.gmra.mxu0 %vm1403_vm3, %v1193_v61  ;;  %v1784_v7 = vsel %vm1403_vm3, %v1291_v62, 0  ;;  %v4917_v17 = vunpack.i.h.bf16 %v4915_v2  ;;  %v4916_v18 = vunpack.i.l.bf16 %v4915_v2 }
 0x31f   : > { %v4912_v11 = vunpack.i.h.bf16 %v4910_v3  ;;  %v4911_v12 = vunpack.i.l.bf16 %v4910_v3  ;;  %4516 = vmatpush3.bf16.xpose.msra.mxu0 %v1784_v7  ;;  %4517 = vmatprep.mubr.msk.bf16.mxu0 %vm5448_vm2, %v5447_v57 }
 0x320   : > { %4527 = vmatprep.subr.bf16.mxu0 %v5447_v57  ;;  %v1195_v32 = vpack.c.bf16 %v4917_v17, %v4916_v18 }
 0x321   : > { %v1292_v9 = vpack.c.bf16 %v4912_v11, %v4911_v12  ;;  %v4925_v25 = vpop.permute.xlu0 %4924 }
 0x322   : > { %v4920_v26 = vpop.permute.xlu1 %4919  ;;  %v4927_v27 = vunpack.i.h.bf16 %v4925_v25  ;;  %v4926_v30 = vunpack.i.l.bf16 %v4925_v25 }
 0x323   : > { %4512 = vmatmul.mubr.msk.bf16.vlgmr.msra.gmra.mxu1 %vm1403_vm3, %v1194_v24  ;;  %v1831_v31 = vsel %vm1403_vm3, %v1292_v9, 0  ;;  %v4922_v34 = vunpack.i.h.bf16 %v4920_v26  ;;  %v4921_v35 = vunpack.i.l.bf16 %v4920_v26 }
 0x324   : > { %v1293_v33 = vpack.c.bf16 %v4927_v27, %v4926_v30  ;;  %4522 = vmatpush3.bf16.xpose.msra.mxu1 %v1831_v31  ;;  %4523 = vmatprep.mubr.msk.bf16.mxu1 %vm5448_vm2, %v5447_v57 }
 0x325   : > { %v4930_v20 = vpop.permute.xlu0 %4929  ;;  %4533 = vmatprep.subr.bf16.mxu1 %v5447_v57  ;;  %v1196_v43 = vpack.c.bf16 %v4922_v34, %v4921_v35 }
 0x326   : > { %v4935_v36 = vpop.permute.xlu1 %4934  ;;  %4518 = vmatmul.mubr.msk.bf16.vlgmr.msra.gmra.mxu0 %vm1403_vm3, %v1195_v32  ;;  %v1878_v37 = vsel %vm1403_vm3, %v1293_v33, 0  ;;  %v4932_v42 = vunpack.i.h.bf16 %v4930_v20  ;;  %v4931_v28 = vunpack.i.l.bf16 %v4930_v20 }
 0x327   : > { %v4937_v40 = vunpack.i.h.bf16 %v4935_v36  ;;  %v4936_v41 = vunpack.i.l.bf16 %v4935_v36  ;;  %4528 = vmatpush3.bf16.xpose.msra.mxu0 %v1878_v37  ;;  %4529 = vmatprep.mubr.msk.bf16.mxu0 %vm5448_vm2, %v5447_v57 }
 0x328   : > { %4539 = vmatprep.subr.bf16.mxu0 %v5447_v57  ;;  %v1197_v29 = vpack.c.bf16 %v4932_v42, %v4931_v28  ;;  %v1396_v42 = vld [vmem:[#allocation11 + $0x8] sm:$0xff] }
 0x329   : > { %v1294_v44 = vpack.c.bf16 %v4937_v40, %v4936_v41  ;;  %v4945_v45 = vpop.permute.xlu0 %4944  ;;  %v1395_v41 = vld [vmem:[#allocation11] sm:$0xff] }
 0x32a   : > { %v4940_v21 = vpop.permute.xlu1 %4939  ;;  %v4947_v46 = vunpack.i.h.bf16 %v4945_v45  ;;  %v4946_v47 = vunpack.i.l.bf16 %v4945_v45 }
 0x32b   : > { %4524 = vmatmul.mubr.msk.bf16.vlgmr.msra.gmra.mxu1 %vm1403_vm3, %v1196_v43  ;;  %v1925_v50 = vsel %vm1403_vm3, %v1294_v44, 0  ;;  %v4942_v51 = vunpack.i.h.bf16 %v4940_v21  ;;  %v4941_v39 = vunpack.i.l.bf16 %v4940_v21 }
 0x32c   : > { %v1295_v38 = vpack.c.bf16 %v4947_v46, %v4946_v47  ;;  %4534 = vmatpush3.bf16.xpose.msra.mxu1 %v1925_v50  ;;  %4535 = vmatprep.mubr.msk.bf16.mxu1 %vm5448_vm2, %v5447_v57 }
 0x32d   : > { %v4955_v53 = vpop.permute.xlu0 %4954  ;;  %4545 = vmatprep.subr.bf16.mxu1 %v5447_v57  ;;  %v1198_v61 = vpack.c.bf16 %v4942_v51, %v4941_v39 }
 0x32e   : > { %v4950_v54 = vpop.permute.xlu1 %4949  ;;  %4530 = vmatmul.mubr.msk.bf16.vlgmr.msra.gmra.mxu0 %vm1403_vm3, %v1197_v29  ;;  %v1972_v48 = vsel %vm1403_vm3, %v1295_v38, 0  ;;  %v4957_v60 = vunpack.i.h.bf16 %v4955_v53  ;;  %v4956_v49 = vunpack.i.l.bf16 %v4955_v53 }
 0x32f   : > { %v4952_v55 = vunpack.i.h.bf16 %v4950_v54  ;;  %v4951_v56 = vunpack.i.l.bf16 %v4950_v54  ;;  %4540 = vmatpush3.bf16.xpose.msra.mxu0 %v1972_v48  ;;  %4541 = vmatprep.mubr.msk.bf16.mxu0 %vm5448_vm2, %v5447_v57 }
 0x330   : > { %4551 = vmatprep.subr.bf16.mxu0 %v5447_v57  ;;  %v1199_v11 = vpack.c.bf16 %v4957_v60, %v4956_v49 }
 0x331   : > { %v1296_v62 = vpack.c.bf16 %v4952_v55, %v4951_v56  ;;  %v4965_v63 = vpop.permute.xlu0 %4964 }
 0x332   : > { %v4960_v1 = vpop.permute.xlu1 %4959  ;;  %v4967_v2 = vunpack.i.h.bf16 %v4965_v63  ;;  %v4966_v3 = vunpack.i.l.bf16 %v4965_v63 }
 0x333   : > { %4536 = vmatmul.mubr.msk.bf16.vlgmr.msra.gmra.mxu1 %vm1403_vm3, %v1198_v61  ;;  %v2019_v7 = vsel %vm1403_vm3, %v1296_v62, 0  ;;  %v4962_v17 = vunpack.i.h.bf16 %v4960_v1  ;;  %v4961_v18 = vunpack.i.l.bf16 %v4960_v1 }
 0x334   : > { %v1297_v12 = vpack.c.bf16 %v4967_v2, %v4966_v3  ;;  %4546 = vmatpush3.bf16.xpose.msra.mxu1 %v2019_v7  ;;  %4547 = vmatprep.mubr.msk.bf16.mxu1 %vm5448_vm2, %v5447_v57 }
 0x335   : > { %v4975_v24 = vpop.permute.xlu0 %4974  ;;  %4557 = vmatprep.subr.bf16.mxu1 %v5447_v57  ;;  %v1200_v32 = vpack.c.bf16 %v4962_v17, %v4961_v18 }
 0x336   : > { %v4970_v9 = vpop.permute.xlu1 %4969  ;;  %4542 = vmatmul.mubr.msk.bf16.vlgmr.msra.gmra.mxu0 %vm1403_vm3, %v1199_v11  ;;  %v2066_v25 = vsel %vm1403_vm3, %v1297_v12, 0  ;;  %v4977_v30 = vunpack.i.h.bf16 %v4975_v24  ;;  %v4976_v31 = vunpack.i.l.bf16 %v4975_v24  ;;  %v1397_v11 = vld [vmem:[#allocation11 + $0x10] sm:$0xff]  ;;  %v1398_v24 = vld [vmem:[#allocation11 + $0x18] sm:$0xff] }
 0x337   : > { %v4972_v26 = vunpack.i.h.bf16 %v4970_v9  ;;  %v4971_v27 = vunpack.i.l.bf16 %v4970_v9  ;;  %4552 = vmatpush3.bf16.xpose.msra.mxu0 %v2066_v25  ;;  %4553 = vmatprep.mubr.msk.bf16.mxu0 %vm5448_vm2, %v5447_v57 }
 0x338   : > { %4563 = vmatprep.subr.bf16.mxu0 %v5447_v57  ;;  %v1201_v20 = vpack.c.bf16 %v4977_v30, %v4976_v31 }
 0x339   : > { %v1298_v33 = vpack.c.bf16 %v4972_v26, %v4971_v27 }
 0x33a   : > { %v4980_v34 = vpop.permute.xlu1 %4979 }
 0x33b   : > { %4548 = vmatmul.mubr.msk.bf16.vlgmr.msra.gmra.mxu1 %vm1403_vm3, %v1200_v32  ;;  %v2113_v35 = vsel %vm1403_vm3, %v1298_v33, 0  ;;  %v4982_v36 = vunpack.i.h.bf16 %v4980_v34  ;;  %v4981_v37 = vunpack.i.l.bf16 %v4980_v34 }
 0x33c   : > { %4558 = vmatpush3.bf16.xpose.msra.mxu1 %v2113_v35  ;;  %4559 = vmatprep.mubr.msk.bf16.mxu1 %vm5448_vm2, %v5447_v57 }
 0x33d   : > { %4569 = vmatprep.subr.bf16.mxu1 %v5447_v57  ;;  %v1202_v40 = vpack.c.bf16 %v4982_v36, %v4981_v37 }
 0x33e   : > { %4554 = vmatmul.mubr.msk.bf16.vlgmr.msra.gmra.mxu0 %vm1403_vm3, %v1201_v20 }
 0x33f   : > { %4564 = vmatpush3.bf16.msra.mxu0 %v1379_v0  ;;  %4565 = vmatprep.mubr.msk.bf16.mxu0 %vm5448_vm2, %v5447_v57 }
 0x340   : > { %4575 = vmatprep.subr.bf16.mxu0 %v5447_v57 }
 0x343   : > { %4560 = vmatmul.mubr.msk.bf16.vlgmr.msra.gmra.mxu1 %vm1403_vm3, %v1202_v40 }
 0x344   : > { %4570 = vmatpush3.bf16.msra.mxu1 %v1380_v8  ;;  %4571 = vmatprep.mubr.msk.bf16.mxu1 %vm5448_vm2, %v5447_v57 }
 0x345   : > { %4581 = vmatprep.subr.bf16.mxu1 %v5447_v57 }
 0x35f   : > { %v1444_v52 = vpop.f32.mrf.mxu0 }
 0x360   : > { %v6058_v58 = vadd.f32 %v1444_v52, %v1395_v41 }
 0x361   : > { %v4471_v0 = vpop.f32.mrf.mxu0 }
 0x362   : > { %v2157_v28 = vsel %vm2156_vm4, %v6058_v58, -inf }
 0x363   : > { %2158 = vmax.xlane.f32.xlu0 %v2157_v28  ;;  %v1447_v43 = vpop.f32.mrf.mxu0  ;;  %v1491_v44 = vpop.f32.mrf.mxu1 }
 0x364   : > { %v6062_v59 = vadd.f32 %v1447_v43, %v1396_v42  ;;  %v6064_v5 = vadd.f32 %v1491_v44, %v1395_v41 }
 0x365   : > { %v4472_v8 = vpop.f32.mrf.mxu0  ;;  %v4477_v45 = vpop.f32.mrf.mxu1 }
 0x366   : > { %v2160_v21 = vsel %vm2156_vm4, %v6062_v59, -inf  ;;  %v2163_v46 = vsel %vm2156_vm4, %v6064_v5, -inf  ;;  %v1399_v45 = vld [vmem:[#allocation11 + $0x20] sm:$0xff] }
 0x367   : > { %v1538_v47 = vpop.f32.mrf.mxu0  ;;  %2161 = vmax.xlane.f32.xlu1 %v2160_v21  ;;  %2164 = vmax.xlane.f32.xlu0 %v2163_v46  ;;  %v1494_v50 = vpop.f32.mrf.mxu1 }
 0x368   : > { %v6070_v29 = vadd.f32 %v1494_v50, %v1396_v42  ;;  %v6072_v39 = vadd.f32 %v1538_v47, %v1395_v41 }
 0x369   : > { %v4478_v38 = vpop.f32.mrf.mxu1  ;;  %v4483_v51 = vpop.f32.mrf.mxu0 }
 0x36a   : > { %v2166_v53 = vsel %vm2156_vm4, %v6070_v29, -inf  ;;  %v2169_v62 = vsel %vm2156_vm4, %v6072_v39, -inf }
 0x36b   : > { %v1541_v54 = vpop.f32.mrf.mxu0  ;;  %2167 = vmax.xlane.f32.xlu0 %v2166_v53  ;;  %v1585_v48 = vpop.f32.mrf.mxu1 }
 0x36c   : > { %v6076_v55 = vadd.f32 %v1541_v54, %v1396_v42  ;;  %v6078_v49 = vadd.f32 %v1585_v48, %v1395_v41  ;;  %v1400_v48 = vld [vmem:[#allocation11 + $0x28] sm:$0xff] }
 0x36d   : > { %v4484_v56 = vpop.f32.mrf.mxu0  ;;  %v4489_v60 = vpop.f32.mrf.mxu1 }
 0x36e   : > { %v2172_v61 = vsel %vm2156_vm4, %v6076_v55, -inf  ;;  %v2175_v3 = vsel %vm2156_vm4, %v6078_v49, -inf }
 0x36f   : > { %2173 = vmax.xlane.f32.xlu1 %v2172_v61  ;;  %2170 = vmax.xlane.f32.xlu0 %v2169_v62  ;;  %v1588_v63 = vpop.f32.mrf.mxu1 }
 0x370   : > { %v6084_v1 = vadd.f32 %v1588_v63, %v1396_v42 }
 0x371   : > { %v4490_v2 = vpop.f32.mrf.mxu1 }
 0x372   : > { %v2178_v7 = vsel %vm2156_vm4, %v6084_v1, -inf }
 0x373   : > { %2176 = vmax.xlane.f32.xlu0 %v2175_v3  ;;  %2179 = vmax.xlane.f32.xlu1 %v2178_v7 }
 0x3d6   : > { %v1632_v12 = vpop.f32.mrf.mxu0 }
 0x3d7   : > { %v6090_v17 = vadd.f32 %v1632_v12, %v1397_v11 }
 0x3d8   : > { %v4495_v18 = vpop.f32.mrf.mxu0 }
 0x3d9   : > { %v2181_v9 = vsel %vm2156_vm4, %v6090_v17, -inf }
 0x3da   : > { %v1679_v25 = vpop.f32.mrf.mxu1  ;;  %2182 = vmax.xlane.f32.xlu0 %v2181_v9  ;;  %v1635_v26 = vpop.f32.mrf.mxu0 }
 0x3db   : > { %v6094_v27 = vadd.f32 %v1679_v25, %v1397_v11  ;;  %v6096_v30 = vadd.f32 %v1635_v26, %v1398_v24 }
 0x3dc   : > { %v4496_v31 = vpop.f32.mrf.mxu0  ;;  %v4501_v32 = vpop.f32.mrf.mxu1 }
 0x3dd   : > { %v2187_v33 = vsel %vm2156_vm4, %v6094_v27, -inf  ;;  %v2184_v34 = vsel %vm2156_vm4, %v6096_v30, -inf }
 0x3de   : > { %v1682_v35 = vpop.f32.mrf.mxu1  ;;  %2188 = vmax.xlane.f32.xlu0 %v2187_v33  ;;  %2185 = vmax.xlane.f32.xlu1 %v2184_v34  ;;  %v1726_v20 = vpop.f32.mrf.mxu0 }
 0x3df   : > { %v6102_v36 = vadd.f32 %v1682_v35, %v1398_v24  ;;  %v6104_v37 = vadd.f32 %v1726_v20, %v1397_v11 }
 0x3e0   : > { %v4502_v40 = vpop.f32.mrf.mxu1  ;;  %v4507_v41 = vpop.f32.mrf.mxu0 }
 0x3e1   : > { %v2190_v52 = vsel %vm2156_vm4, %v6102_v36, -inf  ;;  %v2193_v0 = vsel %vm2156_vm4, %v6104_v37, -inf }
 0x3e2   : > { %2191 = vmax.xlane.f32.xlu1 %v2190_v52  ;;  %2194 = vmax.xlane.f32.xlu0 %v2193_v0  ;;  %v1729_v42 = vpop.f32.mrf.mxu0 }
 0x3e3   : > { %v1773_v28 = vpop.f32.mrf.mxu1  ;;  %v6110_v43 = vadd.f32 %v1729_v42, %v1398_v24  ;;  %v1401_v42 = vld [vmem:[#allocation11 + $0x30] sm:$0xff] }
 0x3e4   : > { %v6112_v44 = vadd.f32 %v1773_v28, %v1397_v11  ;;  %v4508_v8 = vpop.f32.mrf.mxu0 }
 0x3e5   : > { %v4513_v21 = vpop.f32.mrf.mxu1  ;;  %v2196_v46 = vsel %vm2156_vm4, %v6110_v43, -inf }
 0x3e6   : > { %v2199_v47 = vsel %vm2156_vm4, %v6112_v44, -inf  ;;  %2197 = vmax.xlane.f32.xlu1 %v2196_v46  ;;  %v1820_v50 = vpop.f32.mrf.mxu0 }
 0x3e7   : > { %v1776_v38 = vpop.f32.mrf.mxu1  ;;  %2200 = vmax.xlane.f32.xlu0 %v2199_v47  ;;  %v6118_v51 = vadd.f32 %v1820_v50, %v1399_v45 }
 0x3e8   : > { %v6120_v53 = vadd.f32 %v1776_v38, %v1398_v24  ;;  %v4519_v54 = vpop.f32.mrf.mxu0 }
 0x3e9   : > { %v4514_v56 = vpop.f32.mrf.mxu1  ;;  %v2205_v60 = vsel %vm2156_vm4, %v6118_v51, -inf  ;;  %v1402_v54 = vld [vmem:[#allocation11 + $0x38] sm:$0xff] }
 0x3ea   : > { %v2202_v61 = vsel %vm2156_vm4, %v6120_v53, -inf  ;;  %v1823_v62 = vpop.f32.mrf.mxu0 }
 0x3eb   : > { %v1867_v63 = vpop.f32.mrf.mxu1  ;;  %2203 = vmax.xlane.f32.xlu1 %v2202_v61  ;;  %2206 = vmax.xlane.f32.xlu0 %v2205_v60  ;;  %v6126_v2 = vadd.f32 %v1823_v62, %v1400_v48 }
 0x3ec   : > { %v6128_v3 = vadd.f32 %v1867_v63, %v1399_v45  ;;  %v4520_v7 = vpop.f32.mrf.mxu0 }
 0x3ed   : > { %v4525_v11 = vpop.f32.mrf.mxu1  ;;  %v2208_v12 = vsel %vm2156_vm4, %v6126_v2, -inf }
 0x3ee   : > { %v2211_v18 = vsel %vm2156_vm4, %v6128_v3, -inf  ;;  %v1914_v24 = vpop.f32.mrf.mxu0 }
 0x3ef   : > { %v1870_v9 = vpop.f32.mrf.mxu1  ;;  %2212 = vmax.xlane.f32.xlu0 %v2211_v18  ;;  %2209 = vmax.xlane.f32.xlu1 %v2208_v12  ;;  %v6134_v25 = vadd.f32 %v1914_v24, %v1399_v45 }
 0x3f0   : > { %v6136_v26 = vadd.f32 %v1870_v9, %v1400_v48  ;;  %v4531_v32 = vpop.f32.mrf.mxu0 }
 0x3f1   : > { %v4526_v31 = vpop.f32.mrf.mxu1  ;;  %v2217_v33 = vsel %vm2156_vm4, %v6134_v25, -inf }
 0x3f2   : > { %v2214_v34 = vsel %vm2156_vm4, %v6136_v26, -inf  ;;  %v1917_v20 = vpop.f32.mrf.mxu0 }
 0x3f3   : > { %v1961_v35 = vpop.f32.mrf.mxu1  ;;  %2215 = vmax.xlane.f32.xlu1 %v2214_v34  ;;  %2218 = vmax.xlane.f32.xlu0 %v2217_v33  ;;  %v6144_v41 = vadd.f32 %v1917_v20, %v1400_v48 }
 0x3f4   : > { %v6142_v40 = vadd.f32 %v1961_v35, %v1399_v45  ;;  %v4532_v0 = vpop.f32.mrf.mxu0 }
 0x3f5   : > { %v4537_v52 = vpop.f32.mrf.mxu1  ;;  %v2220_v8 = vsel %vm2156_vm4, %v6144_v41, -inf }
 0x3f6   : > { %v2223_v28 = vsel %vm2156_vm4, %v6142_v40, -inf  ;;  %v2008_v46 = vpop.f32.mrf.mxu0 }
 0x3f7   : > { %v1964_v21 = vpop.f32.mrf.mxu1  ;;  %2224 = vmax.xlane.f32.xlu0 %v2223_v28  ;;  %2221 = vmax.xlane.f32.xlu1 %v2220_v8  ;;  %v6152_v50 = vadd.f32 %v2008_v46, %v1401_v42  ;;  %v6174_v28 = vpop.permute.xlu0 %4984 }
 0x3f8   : > { %v6150_v47 = vadd.f32 %v1964_v21, %v1400_v48  ;;  %v4543_v38 = vpop.f32.mrf.mxu0 }
 0x3f9   : > { %v4538_v45 = vpop.f32.mrf.mxu1  ;;  %v2229_v60 = vsel %vm2156_vm4, %v6152_v50, -inf }
 0x3fa   : > { %v2226_v56 = vsel %vm2156_vm4, %v6150_v47, -inf  ;;  %v2011_v62 = vpop.f32.mrf.mxu0 }
 0x3fb   : > { %v2055_v61 = vpop.f32.mrf.mxu1  ;;  %2227 = vmax.xlane.f32.xlu1 %v2226_v56  ;;  %2230 = vmax.xlane.f32.xlu0 %v2229_v60  ;;  %v6160_v7 = vadd.f32 %v2011_v62, %v1402_v54  ;;  %v6184_v60 = vpop.permute.xlu1 %4989 }
 0x3fc   : > { %v6158_v63 = vadd.f32 %v2055_v61, %v1401_v42  ;;  %v4544_v11 = vpop.f32.mrf.mxu0 }
 0x3fd   : > { %v4549_v48 = vpop.f32.mrf.mxu1  ;;  %v2232_v18 = vsel %vm2156_vm4, %v6160_v7, -inf }
 0x3fe   : > { %v2235_v12 = vsel %vm2156_vm4, %v6158_v63, -inf  ;;  %v2102_v9 = vpop.f32.mrf.mxu0 }
 0x3ff   : > { %v2058_v24 = vpop.f32.mrf.mxu1  ;;  %2236 = vmax.xlane.f32.xlu0 %v2235_v12  ;;  %2233 = vmax.xlane.f32.xlu1 %v2232_v18  ;;  %v6168_v32 = vadd.f32 %v2102_v9, %v1401_v42  ;;  %v6192_v12 = vpop.permute.xlu1 %4999 }
 0x400   : > { %v6166_v31 = vadd.f32 %v2058_v24, %v1402_v54  ;;  %v4555_v34 = vpop.f32.mrf.mxu0 }
 0x401   : > { %v4550_v33 = vpop.f32.mrf.mxu1  ;;  %v2241_v20 = vsel %vm2156_vm4, %v6168_v32, -inf }
 0x402   : > { %v2238_v35 = vsel %vm2156_vm4, %v6166_v31, -inf  ;;  %v2105_v0 = vpop.f32.mrf.mxu0 }
 0x403   : > { %v2149_v52 = vpop.f32.mrf.mxu1  ;;  %2239 = vmax.xlane.f32.xlu1 %v2238_v35  ;;  %2242 = vmax.xlane.f32.xlu0 %v2241_v20  ;;  %v6178_v21 = vadd.f32 %v2105_v0, %v1402_v54  ;;  %v6196_v24 = vpop.permute.xlu1 %5009 }
 0x404   : > { %v6176_v8 = vadd.f32 %v2149_v52, %v1401_v42  ;;  %v4556_v46 = vpop.f32.mrf.mxu0  ;;  %v6188_v42 = vpop.permute.xlu0 %4994 }
 0x405   : > { %v4561_v45 = vpop.f32.mrf.mxu1  ;;  %v2244_v56 = vsel %vm2156_vm4, %v6178_v21, -inf }
 0x406   : > { %v2247_v38 = vsel %vm2156_vm4, %v6176_v8, -inf }
 0x407   : > { %v2152_v61 = vpop.f32.mrf.mxu1  ;;  %2248 = vmax.xlane.f32.xlu0 %v2247_v38  ;;  %2245 = vmax.xlane.f32.xlu1 %v2244_v56  ;;  %v6198_v33 = vpop.permute.xlu1 %5014 }
 0x408   : > { %v6186_v62 = vadd.f32 %v2152_v61, %v1402_v54  ;;  %v6194_v18 = vpop.permute.xlu0 %5004 }
 0x409   : > { %v4562_v48 = vpop.f32.mrf.mxu1 }
 0x40a   : > { %v2250_v11 = vsel %vm2156_vm4, %v6186_v62, -inf }
 0x40b   : > { %2251 = vmax.xlane.f32.xlu1 %v2250_v11  ;;  %v6204_v54 = vpop.permute.xlu1 %5019 }
 0x40c   : > { %v2159_v9 = vpop.xlane.xlu0 %2158 }
 0x40d   : > { %v2253_v20 = vsub.f32 %v6058_v58, %v2159_v9 }
 0x40f   : > { %v2162_v52 = vpop.xlane.xlu1 %2161  ;;  %v2285_v45 = vmul.f32 1.442695, %v2253_v20 }
 0x410   : > { %v2165_v34 = vpop.xlane.xlu0 %2164  ;;  %v2254_v0 = vsub.f32 %v6062_v59, %v2162_v52 }
 0x411   : > { %v2255_v38 = vsub.f32 %v6064_v5, %v2165_v34  ;;  %5065 = vpow2.f32 %v2285_v45 }
 0x412   : > { %v2287_v56 = vmul.f32 1.442695, %v2254_v0 }
 0x413   : > { %v2174_v48 = vpop.xlane.xlu1 %2173 }
 0x414   : > { %v2168_v35 = vpop.xlane.xlu0 %2167  ;;  %5067 = vpow2.f32 %v2287_v56  ;;  %v2258_v58 = vsub.f32 %v6076_v55, %v2174_v48 }
 0x415   : > { %v2256_v61 = vsub.f32 %v6070_v29, %v2168_v35 }
 0x416   : > { %v2295_v5 = vmul.f32 1.442695, %v2258_v58 }
 0x417   : > { %v2291_v23 = vmul.f32 1.442695, %v2256_v61  ;;  %v2180_v20 = vpop.xlane.xlu1 %2179 }
 0x418   : > { %v2171_v46 = vpop.xlane.xlu0 %2170  ;;  %v2260_v29 = vsub.f32 %v6084_v1, %v2180_v20 }
 0x41a   : > { %v2299_v35 = vmul.f32 1.442695, %v2260_v29 }
 0x41c   : > { %5029 = vrot.lane.b32.xlu1 %v5927_v10, %s5451_s13  ;;  %v2289_v10 = vmul.f32 1.442695, %v2255_v38  ;;  %v2177_v11 = vpop.xlane.xlu0 %2176 }
 0x41d   : > { %5024 = vrot.lane.b32.xlu0 %v5911_v4, %s5451_s13  ;;  %v2257_v4 = vsub.f32 %v6072_v39, %v2171_v46  ;;  %v2259_v59 = vsub.f32 %v6078_v49, %v2177_v11 }
 0x41e   : > { %5069 = vpow2.f32 %v2289_v10  ;;  %v6214_v39 = vpop.eup %5065 }
 0x41f   : > { %v2293_v9 = vmul.f32 1.442695, %v2257_v4  ;;  %5071 = vpow2.f32 %v2291_v23  ;;  %v2297_v34 = vmul.f32 1.442695, %v2259_v59  ;;  %v2349_v55 = vsel %vm2156_vm4, %v6214_v39, 0.0 }
 0x421   : > { %5073 = vpow2.f32 %v2293_v9  ;;  %v6216_v52 = vpop.eup %5067 }
 0x422   : > { %5075 = vpow2.f32 %v2295_v5  ;;  %v2352_v1 = vsel %vm2156_vm4, %v6216_v52, 0.0 }
 0x423   : > { %5077 = vpow2.f32 %v2297_v34 }
 0x424   : > { %5079 = vpow2.f32 %v2299_v35 }
 0x42b   : > { %v6220_v0 = vpop.eup %5069 }
 0x42c   : > { %v6222_v23 = vpop.eup %5071  ;;  %v2355_v49 = vsel %vm2156_vm4, %v6220_v0, 0.0 }
 0x42d   : > { %v2358_v56 = vsel %vm2156_vm4, %v6222_v23, 0.0 }
 0x42e   : > { %v6228_v46 = vpop.eup %5073 }
 0x42f   : > { %v6230_v45 = vpop.eup %5075  ;;  %v2361_v38 = vsel %vm2156_vm4, %v6228_v46, 0.0 }
 0x430   : > { %v6236_v61 = vpop.eup %5077  ;;  %v2364_v10 = vsel %vm2156_vm4, %v6230_v45, 0.0 }
 0x431   : > { %v2367_v48 = vsel %vm2156_vm4, %v6236_v61, 0.0  ;;  %v6242_v4 = vpop.eup %5079 }
 0x432   : > { %v2370_v11 = vsel %vm2156_vm4, %v6242_v4, 0.0 }
 0x43c   : > { %2350 = vadd.xlane.f32.xlu0 %v2349_v55 }
 0x440   : > { %2356 = vadd.xlane.f32.xlu0 %v2355_v49  ;;  %2353 = vadd.xlane.f32.xlu1 %v2352_v1 }
 0x444   : > { %2362 = vadd.xlane.f32.xlu0 %v2361_v38  ;;  %2359 = vadd.xlane.f32.xlu1 %v2358_v56 }
 0x448   : > { %2368 = vadd.xlane.f32.xlu0 %v2367_v48  ;;  %2365 = vadd.xlane.f32.xlu1 %v2364_v10 }
 0x44c   : > { %2371 = vadd.xlane.f32.xlu1 %v2370_v11 }
 0x463   : > { %v2183_v58 = vpop.xlane.xlu0 %2182 }
 0x464   : > { %v2261_v9 = vsub.f32 %v6090_v17, %v2183_v58 }
 0x466   : > { %v2301_v59 = vmul.f32 1.442695, %v2261_v9 }
 0x467   : > { %v2189_v20 = vpop.xlane.xlu0 %2188  ;;  %v2186_v5 = vpop.xlane.xlu1 %2185 }
 0x468   : > { %5081 = vpow2.f32 %v2301_v59  ;;  %v2263_v29 = vsub.f32 %v6094_v27, %v2189_v20  ;;  %v2262_v34 = vsub.f32 %v6096_v30, %v2186_v5 }
 0x46a   : > { %v2305_v35 = vmul.f32 1.442695, %v2263_v29  ;;  %v2303_v55 = vmul.f32 1.442695, %v2262_v34 }
 0x46b   : > { %v2192_v49 = vpop.xlane.xlu1 %2191  ;;  %v2195_v1 = vpop.xlane.xlu0 %2194 }
 0x46c   : > { %5083 = vpow2.f32 %v2305_v35  ;;  %v2264_v38 = vsub.f32 %v6102_v36, %v2192_v49  ;;  %v2265_v56 = vsub.f32 %v6104_v37, %v2195_v1 }
 0x46d   : > { %5085 = vpow2.f32 %v2303_v55 }
 0x46e   : > { %v2307_v48 = vmul.f32 1.442695, %v2264_v38  ;;  %v2309_v17 = vmul.f32 1.442695, %v2265_v56 }
 0x46f   : > { %v2198_v10 = vpop.xlane.xlu1 %2197 }
 0x470   : > { %5087 = vpow2.f32 %v2307_v48  ;;  %v2201_v11 = vpop.xlane.xlu0 %2200  ;;  %v2266_v58 = vsub.f32 %v6110_v43, %v2198_v10 }
 0x471   : > { %5089 = vpow2.f32 %v2309_v17  ;;  %v2267_v27 = vsub.f32 %v6112_v44, %v2201_v11 }
 0x472   : > { %v2311_v30 = vmul.f32 1.442695, %v2266_v58 }
 0x473   : > { %v2313_v9 = vmul.f32 1.442695, %v2267_v27 }
 0x474   : > { %5091 = vpow2.f32 %v2311_v30  ;;  %v2204_v59 = vpop.xlane.xlu1 %2203  ;;  %v2207_v20 = vpop.xlane.xlu0 %2206 }
 0x475   : > { %v6253_v5 = vpop.eup %5081  ;;  %5093 = vpow2.f32 %v2313_v9  ;;  %v2268_v36 = vsub.f32 %v6120_v53, %v2204_v59  ;;  %v2269_v37 = vsub.f32 %v6118_v51, %v2207_v20 }
 0x476   : > { %v2373_v29 = vsel %vm2156_vm4, %v6253_v5, 0.0 }
 0x477   : > { %v2315_v34 = vmul.f32 1.442695, %v2268_v36  ;;  %v2317_v43 = vmul.f32 1.442695, %v2269_v37  ;;  %2374 = vadd.xlane.f32.xlu0 %v2373_v29 }
 0x478   : > { %v2213_v35 = vpop.xlane.xlu0 %2212  ;;  %v2210_v44 = vpop.xlane.xlu1 %2209 }
 0x479   : > { %v6259_v55 = vpop.eup %5083  ;;  %5095 = vpow2.f32 %v2315_v34  ;;  %v2271_v49 = vsub.f32 %v6128_v3, %v2213_v35  ;;  %v2270_v1 = vsub.f32 %v6126_v2, %v2210_v44 }
 0x47a   : > { %v6263_v38 = vpop.eup %5085  ;;  %5097 = vpow2.f32 %v2317_v43  ;;  %v2379_v51 = vsel %vm2156_vm4, %v6259_v55, 0.0 }
 0x47b   : > { %v2321_v53 = vmul.f32 1.442695, %v2271_v49  ;;  %v2319_v56 = vmul.f32 1.442695, %v2270_v1  ;;  %2380 = vadd.xlane.f32.xlu0 %v2379_v51  ;;  %v2376_v48 = vsel %vm2156_vm4, %v6263_v38, 0.0 }
 0x47c   : > { %v2216_v17 = vpop.xlane.xlu1 %2215  ;;  %v2219_v10 = vpop.xlane.xlu0 %2218  ;;  %2377 = vadd.xlane.f32.xlu1 %v2376_v48 }
 0x47d   : > { %v6269_v11 = vpop.eup %5087  ;;  %5099 = vpow2.f32 %v2321_v53  ;;  %v2272_v2 = vsub.f32 %v6136_v26, %v2216_v17  ;;  %v2273_v3 = vsub.f32 %v6134_v25, %v2219_v10 }
 0x47e   : > { %v6273_v58 = vpop.eup %5089  ;;  %5101 = vpow2.f32 %v2319_v56  ;;  %v2382_v27 = vsel %vm2156_vm4, %v6269_v11, 0.0 }
 0x47f   : > { %v2323_v30 = vmul.f32 1.442695, %v2272_v2  ;;  %v2325_v9 = vmul.f32 1.442695, %v2273_v3  ;;  %v2385_v59 = vsel %vm2156_vm4, %v6273_v58, 0.0 }
 0x480   : > { %v2225_v20 = vpop.xlane.xlu0 %2224  ;;  %v2222_v36 = vpop.xlane.xlu1 %2221  ;;  %2386 = vadd.xlane.f32.xlu0 %v2385_v59  ;;  %2383 = vadd.xlane.f32.xlu1 %v2382_v27 }
 0x481   : > { %v6279_v37 = vpop.eup %5091  ;;  %5103 = vpow2.f32 %v2323_v30  ;;  %v2275_v25 = vsub.f32 %v6142_v40, %v2225_v20  ;;  %v2274_v26 = vsub.f32 %v6144_v41, %v2222_v36 }
 0x482   : > { %v6283_v29 = vpop.eup %5093  ;;  %5105 = vpow2.f32 %v2325_v9  ;;  %v2388_v34 = vsel %vm2156_vm4, %v6279_v37, 0.0 }
 0x483   : > { %v2329_v43 = vmul.f32 1.442695, %v2275_v25  ;;  %v2327_v35 = vmul.f32 1.442695, %v2274_v26  ;;  %v2391_v44 = vsel %vm2156_vm4, %v6283_v29, 0.0 }
 0x484   : > { %v2228_v49 = vpop.xlane.xlu1 %2227  ;;  %v2231_v1 = vpop.xlane.xlu0 %2230  ;;  %2392 = vadd.xlane.f32.xlu0 %v2391_v44  ;;  %2389 = vadd.xlane.f32.xlu1 %v2388_v34 }
 0x485   : > { %5107 = vpow2.f32 %v2329_v43  ;;  %v2276_v40 = vsub.f32 %v6150_v47, %v2228_v49  ;;  %v2277_v41 = vsub.f32 %v6152_v50, %v2231_v1 }
 0x486   : > { %v6291_v51 = vpop.eup %5095  ;;  %5109 = vpow2.f32 %v2327_v35 }
 0x487   : > { %v6293_v53 = vpop.eup %5097  ;;  %v2331_v56 = vmul.f32 1.442695, %v2276_v40  ;;  %v2394_v48 = vsel %vm2156_vm4, %v6291_v51, 0.0  ;;  %v2333_v17 = vmul.f32 1.442695, %v2277_v41 }
 0x488   : > { %v2237_v10 = vpop.xlane.xlu0 %2236  ;;  %v2234_v2 = vpop.xlane.xlu1 %2233  ;;  %v2397_v3 = vsel %vm2156_vm4, %v6293_v53, 0.0  ;;  %2395 = vadd.xlane.f32.xlu1 %v2394_v48 }
 0x489   : > { %5111 = vpow2.f32 %v2331_v56  ;;  %v2279_v47 = vsub.f32 %v6158_v63, %v2237_v10  ;;  %v2278_v50 = vsub.f32 %v6160_v7, %v2234_v2  ;;  %2398 = vadd.xlane.f32.xlu0 %v2397_v3 }
 0x48a   : > { %v6301_v27 = vpop.eup %5099  ;;  %5113 = vpow2.f32 %v2333_v17 }
 0x48b   : > { %v6303_v30 = vpop.eup %5101  ;;  %v2337_v9 = vmul.f32 1.442695, %v2279_v47  ;;  %v2335_v59 = vmul.f32 1.442695, %v2278_v50  ;;  %v2403_v20 = vsel %vm2156_vm4, %v6301_v27, 0.0 }
 0x48c   : > { %v2240_v36 = vpop.xlane.xlu1 %2239  ;;  %v2243_v25 = vpop.xlane.xlu0 %2242  ;;  %v2400_v26 = vsel %vm2156_vm4, %v6303_v30, 0.0 }
 0x48d   : > { %5115 = vpow2.f32 %v2337_v9  ;;  %v2280_v63 = vsub.f32 %v6166_v31, %v2240_v36  ;;  %2404 = vadd.xlane.f32.xlu0 %v2403_v20  ;;  %v2281_v7 = vsub.f32 %v6168_v32, %v2243_v25  ;;  %2401 = vadd.xlane.f32.xlu1 %v2400_v26 }
 0x48e   : > { %v6311_v34 = vpop.eup %5103  ;;  %5117 = vpow2.f32 %v2335_v59 }
 0x48f   : > { %v6313_v43 = vpop.eup %5105  ;;  %v2339_v35 = vmul.f32 1.442695, %v2280_v63  ;;  %v2406_v44 = vsel %vm2156_vm4, %v6311_v34, 0.0  ;;  %v2341_v49 = vmul.f32 1.442695, %v2281_v7 }
 0x490   : > { %v2409_v1 = vsel %vm2156_vm4, %v6313_v43, 0.0  ;;  %v2249_v40 = vpop.xlane.xlu0 %2248  ;;  %v2246_v41 = vpop.xlane.xlu1 %2245 }
 0x491   : > { %5119 = vpow2.f32 %v2339_v35  ;;  %2410 = vadd.xlane.f32.xlu0 %v2409_v1  ;;  %v2283_v31 = vsub.f32 %v6176_v8, %v2249_v40  ;;  %2407 = vadd.xlane.f32.xlu1 %v2406_v44  ;;  %v2282_v32 = vsub.f32 %v6178_v21, %v2246_v41 }
 0x492   : > { %v6321_v56 = vpop.eup %5107  ;;  %5121 = vpow2.f32 %v2341_v49 }
 0x493   : > { %v6323_v48 = vpop.eup %5109  ;;  %v2345_v17 = vmul.f32 1.442695, %v2283_v31  ;;  %v2343_v10 = vmul.f32 1.442695, %v2282_v32  ;;  %v2415_v2 = vsel %vm2156_vm4, %v6321_v56, 0.0 }
 0x494   : > { %v2412_v3 = vsel %vm2156_vm4, %v6323_v48, 0.0  ;;  %v2252_v47 = vpop.xlane.xlu1 %2251 }
 0x495   : > { %5123 = vpow2.f32 %v2345_v17  ;;  %2416 = vadd.xlane.f32.xlu0 %v2415_v2  ;;  %2413 = vadd.xlane.f32.xlu1 %v2412_v3  ;;  %v2284_v8 = vsub.f32 %v6186_v62, %v2252_v47  ;;  %v6370_v17 = vpop.permute.xlu0 %5024 }
 0x496   : > { %v6330_v21 = vpop.eup %5111  ;;  %5125 = vpow2.f32 %v2343_v10 }
 0x497   : > { %v2347_v50 = vmul.f32 1.442695, %v2284_v8  ;;  %v2418_v9 = vsel %vm2156_vm4, %v6330_v21, 0.0  ;;  %v6334_v59 = vpop.eup %5113 }
 0x498   : > { %v2421_v62 = vsel %vm2156_vm4, %v6334_v59, 0.0  ;;  %v6372_v10 = vpop.permute.xlu1 %5029 }
 0x499   : > { %5127 = vpow2.f32 %v2347_v50  ;;  %2419 = vadd.xlane.f32.xlu1 %v2418_v9 }
 0x49a   : > { %v6336_v20 = vpop.eup %5115 }
 0x49b   : > { %v2427_v36 = vsel %vm2156_vm4, %v6336_v20, 0.0  ;;  %v6340_v25 = vpop.eup %5117 }
 0x49c   : > { %2428 = vadd.xlane.f32.xlu0 %v2427_v36  ;;  %v2424_v63 = vsel %vm2156_vm4, %v6340_v25, 0.0 }
 0x49d   : > { %2422 = vadd.xlane.f32.xlu1 %v2421_v62 }
 0x49e   : > { %v6344_v26 = vpop.eup %5119 }
 0x49f   : > { %v2430_v7 = vsel %vm2156_vm4, %v6344_v26, 0.0  ;;  %v6350_v35 = vpop.eup %5121 }
 0x4a0   : > { %2425 = vadd.xlane.f32.xlu0 %v2424_v63  ;;  %v2433_v40 = vsel %vm2156_vm4, %v6350_v35, 0.0 }
 0x4a1   : > { %2431 = vadd.xlane.f32.xlu1 %v2430_v7 }
 0x4a2   : > { %v6352_v44 = vpop.eup %5123 }
 0x4a3   : > { %v2439_v49 = vsel %vm2156_vm4, %v6352_v44, 0.0  ;;  %v6356_v1 = vpop.eup %5125 }
 0x4a4   : > { %2440 = vadd.xlane.f32.xlu0 %v2439_v49  ;;  %v2436_v31 = vsel %vm2156_vm4, %v6356_v1, 0.0 }
 0x4a5   : > { %2434 = vadd.xlane.f32.xlu1 %v2433_v40 }
 0x4a6   : > { %v6360_v41 = vpop.eup %5127 }
 0x4a7   : > { %v2442_v32 = vsel %vm2156_vm4, %v6360_v41, 0.0 }
 0x4a8   : > { %2437 = vadd.xlane.f32.xlu0 %v2436_v31 }
 0x4a9   : > { %2443 = vadd.xlane.f32.xlu1 %v2442_v32 }
 0x4ba   : > { %5039 = vrot.lane.b32.xlu1 %v5954_v22, %s5451_s13 }
 0x4be   : > { %5034 = vrot.lane.b32.xlu0 %v5942_v15, %s5451_s13 }
 0x4c5   : > { %v2351_v2 = vpop.xlane.xlu0 %2350 }
 0x4c6   : > { %5129 = vrcp.f32 %v2351_v2 }
 0x4c9   : > { %v2357_v3 = vpop.xlane.xlu0 %2356  ;;  %v2354_v47 = vpop.xlane.xlu1 %2353 }
 0x4ca   : > { %5131 = vrcp.f32 %v2354_v47 }
 0x4cb   : > { %5133 = vrcp.f32 %v2357_v3 }
 0x4cd   : > { %v2363_v8 = vpop.xlane.xlu0 %2362  ;;  %v2360_v50 = vpop.xlane.xlu1 %2359 }
 0x4ce   : > { %5135 = vrcp.f32 %v2360_v50 }
 0x4cf   : > { %5137 = vrcp.f32 %v2363_v8 }
 0x4d1   : > { %v2369_v9 = vpop.xlane.xlu0 %2368  ;;  %v2366_v36 = vpop.xlane.xlu1 %2365 }
 0x4d2   : > { %5139 = vrcp.f32 %v2366_v36  ;;  %v4991_v36 = vunpack.i.l.bf16 %v6184_v60 }
 0x4d3   : > { %5141 = vrcp.f32 %v2369_v9  ;;  %v5130_v15 = vpop.eup %5129  ;;  %v4992_v9 = vunpack.i.h.bf16 %v6184_v60 }
 0x4d4   : > { %v2477_v63 = vmul.f32 %v5130_v15, %v6214_v39  ;;  %v4987_v39 = vunpack.i.h.bf16 %v6174_v28 }
 0x4d5   : > { %v2372_v22 = vpop.xlane.xlu1 %2371  ;;  %v1384_v19 = vpack.c.bf16 %v4992_v9, %v4991_v36  ;;  %v4997_v9 = vunpack.i.h.bf16 %v6188_v42 }
 0x4d6   : > { %5143 = vrcp.f32 %v2372_v22 }
 0x4d7   : > { %v5132_v62 = vpop.eup %5131 }
 0x4d8   : > { %v2478_v7 = vmul.f32 %v5132_v62, %v6216_v52  ;;  %v5134_v49 = vpop.eup %5133  ;;  %v4986_v52 = vunpack.i.l.bf16 %v6174_v28 }
 0x4d9   : > { %v2479_v32 = vmul.f32 %v5134_v49, %v6220_v0 }
 0x4da   : > { %v2509_v40 = vpack.c.bf16 %v2478_v7, %v2477_v63 }
 0x4db   : > { %v5136_v31 = vpop.eup %5135 }
 0x4dc   : > { %4566 = vmatmul.mubr.msk.bf16.vlgmr.msra.gmra.mxu0 %vm2156_vm4, %v2509_v40  ;;  %v2480_v2 = vmul.f32 %v5136_v31, %v6222_v23  ;;  %v5138_v3 = vpop.eup %5137 }
 0x4dd   : > { %4576 = vmatpush3.bf16.msra.mxu0 %v1381_v16  ;;  %4577 = vmatprep.mubr.msk.bf16.mxu0 %vm5448_vm2, %v5447_v57  ;;  %v2481_v0 = vmul.f32 %v5138_v3, %v6228_v46  ;;  %v1383_v16 = vpack.c.bf16 %v4987_v39, %v4986_v52 }
 0x4de   : > { %v2510_v47 = vpack.c.bf16 %v2480_v2, %v2479_v32  ;;  %4587 = vmatprep.subr.bf16.mxu0 %v5447_v57  ;;  %v5007_v32 = vunpack.i.h.bf16 %v6194_v18  ;;  %v5006_v2 = vunpack.i.l.bf16 %v6194_v18 }
 0x4df   : > { %v5140_v8 = vpop.eup %5139 }
 0x4e0   : > { %v5142_v50 = vpop.eup %5141  ;;  %4572 = vmatmul.mubr.msk.bf16.vlgmr.msra.gmra.mxu1 %vm2156_vm4, %v2510_v47  ;;  %v2482_v23 = vmul.f32 %v5140_v8, %v6230_v45 }
 0x4e1   : > { %4582 = vmatpush3.bf16.msra.mxu1 %v6685_v6  ;;  %4583 = vmatprep.mubr.msk.bf16.mxu1 %vm5448_vm2, %v5447_v57  ;;  %v2483_v46 = vmul.f32 %v5142_v50, %v6236_v61  ;;  %v5012_v6 = vunpack.i.h.bf16 %v6196_v24 }
 0x4e2   : > { %v2511_v28 = vpack.c.bf16 %v2482_v23, %v2481_v0  ;;  %4593 = vmatprep.subr.bf16.mxu1 %v5447_v57  ;;  %v1385_v0 = vpack.c.bf16 %v5007_v32, %v5006_v2 }
 0x4e3   : > { %v5144_v13 = vpop.eup %5143 }
 0x4e4   : > { %v2484_v45 = vmul.f32 %v5144_v13, %v6242_v4  ;;  %4578 = vmatmul.mubr.msk.bf16.vlgmr.msra.gmra.mxu0 %vm2156_vm4, %v2511_v28  ;;  %v5011_v13 = vunpack.i.l.bf16 %v6196_v24  ;;  %v4996_v24 = vunpack.i.l.bf16 %v6188_v42 }
 0x4e5   : > { %4588 = vmatpush3.bf16.msra.mxu0 %v1383_v16  ;;  %4589 = vmatprep.mubr.msk.bf16.mxu0 %vm5448_vm2, %v5447_v57 }
 0x4e6   : > { %v2512_v14 = vpack.c.bf16 %v2484_v45, %v2483_v46  ;;  %4599 = vmatprep.subr.bf16.mxu0 %v5447_v57  ;;  %v1386_v45 = vpack.c.bf16 %v5012_v6, %v5011_v13  ;;  %v1387_v42 = vpack.c.bf16 %v4997_v9, %v4996_v24  ;;  %v5027_v6 = vunpack.i.h.bf16 %v6370_v17 }
 0x4e7   : > { %v5032_v24 = vunpack.i.h.bf16 %v6372_v10 }
 0x4e8   : > { %4584 = vmatmul.mubr.msk.bf16.vlgmr.msra.gmra.mxu1 %vm2156_vm4, %v2512_v14 }
 0x4e9   : > { %4594 = vmatpush3.bf16.msra.mxu1 %v1384_v19  ;;  %4595 = vmatprep.mubr.msk.bf16.mxu1 %vm5448_vm2, %v5447_v57 }
 0x4ea   : > { %4605 = vmatprep.subr.bf16.mxu1 %v5447_v57 }
 0x500   : > { %v2375_v60 = vpop.xlane.xlu0 %2374 }
 0x501   : > { %5145 = vrcp.f32 %v2375_v60 }
 0x504   : > { %v2381_v61 = vpop.xlane.xlu0 %2380 }
 0x505   : > { %v2378_v4 = vpop.xlane.xlu1 %2377 }
 0x506   : > { %5147 = vrcp.f32 %v2378_v4  ;;  %v5002_v4 = vunpack.i.h.bf16 %v6192_v12 }
 0x507   : > { %5149 = vrcp.f32 %v2381_v61 }
 0x509   : > { %v2387_v22 = vpop.xlane.xlu0 %2386  ;;  %v2384_v15 = vpop.xlane.xlu1 %2383 }
 0x50a   : > { %5151 = vrcp.f32 %v2384_v15  ;;  %v5001_v15 = vunpack.i.l.bf16 %v6192_v12 }
 0x50b   : > { %5153 = vrcp.f32 %v2387_v22 }
 0x50d   : > { %v2393_v62 = vpop.xlane.xlu0 %2392  ;;  %v2390_v63 = vpop.xlane.xlu1 %2389 }
 0x50e   : > { %5155 = vrcp.f32 %v2390_v63  ;;  %v5146_v7 = vpop.eup %5145 }
 0x50f   : > { %5157 = vrcp.f32 %v2393_v62  ;;  %v2485_v3 = vmul.f32 %v5146_v7, %v6253_v5 }
 0x511   : > { %v2396_v49 = vpop.xlane.xlu1 %2395 }
 0x512   : > { %v2399_v40 = vpop.xlane.xlu0 %2398  ;;  %5159 = vrcp.f32 %v2396_v49  ;;  %v1388_v49 = vpack.c.bf16 %v5002_v4, %v5001_v15 }
 0x513   : > { %v5148_v31 = vpop.eup %5147  ;;  %5161 = vrcp.f32 %v2399_v40  ;;  %v5017_v40 = vunpack.i.h.bf16 %v6198_v33 }
 0x514   : > { %v2486_v39 = vmul.f32 %v5148_v31, %v6263_v38  ;;  %v5150_v52 = vpop.eup %5149 }
 0x515   : > { %v2487_v18 = vmul.f32 %v5150_v52, %v6259_v55 }
 0x516   : > { %v2405_v47 = vpop.xlane.xlu0 %2404  ;;  %v2402_v8 = vpop.xlane.xlu1 %2401  ;;  %v2513_v50 = vpack.c.bf16 %v2486_v39, %v2485_v3 }
 0x517   : > { %v5152_v23 = vpop.eup %5151  ;;  %5163 = vrcp.f32 %v2402_v8  ;;  %v5021_v8 = vunpack.i.l.bf16 %v6204_v54 }
 0x518   : > { %4590 = vmatmul.mubr.msk.bf16.vlgmr.msra.gmra.mxu0 %vm2156_vm4, %v2513_v50  ;;  %v2488_v5 = vmul.f32 %v5152_v23, %v6269_v11  ;;  %v5154_v38 = vpop.eup %5153  ;;  %5165 = vrcp.f32 %v2405_v47 }
 0x519   : > { %4600 = vmatpush3.bf16.msra.mxu0 %v1385_v0  ;;  %4601 = vmatprep.mubr.msk.bf16.mxu0 %vm5448_vm2, %v5447_v57  ;;  %v2489_v11 = vmul.f32 %v5154_v38, %v6273_v58 }
 0x51a   : > { %v2411_v16 = vpop.xlane.xlu0 %2410  ;;  %v2408_v28 = vpop.xlane.xlu1 %2407  ;;  %4611 = vmatprep.subr.bf16.mxu0 %v5447_v57  ;;  %v2514_v36 = vpack.c.bf16 %v2488_v5, %v2487_v18 }
 0x51b   : > { %v5156_v46 = vpop.eup %5155  ;;  %5167 = vrcp.f32 %v2408_v28 }
 0x51c   : > { %v5158_v55 = vpop.eup %5157  ;;  %4596 = vmatmul.mubr.msk.bf16.vlgmr.msra.gmra.mxu1 %vm2156_vm4, %v2514_v36  ;;  %v2490_v14 = vmul.f32 %v5156_v46, %v6279_v37  ;;  %5169 = vrcp.f32 %v2411_v16  ;;  %v5031_v46 = vunpack.i.l.bf16 %v6372_v10 }
 0x51d   : > { %4606 = vmatpush3.bf16.msra.mxu1 %v1386_v45  ;;  %4607 = vmatprep.mubr.msk.bf16.mxu1 %vm5448_vm2, %v5447_v57  ;;  %v2491_v58 = vmul.f32 %v5158_v55, %v6283_v29  ;;  %v5016_v29 = vunpack.i.l.bf16 %v6198_v33  ;;  %v5022_v33 = vunpack.i.h.bf16 %v6204_v54  ;;  %v5026_v54 = vunpack.i.l.bf16 %v6370_v17 }
 0x51e   : > { %v2417_v19 = vpop.xlane.xlu0 %2416  ;;  %v2414_v60 = vpop.xlane.xlu1 %2413  ;;  %v2515_v22 = vpack.c.bf16 %v2490_v14, %v2489_v11  ;;  %4617 = vmatprep.subr.bf16.mxu1 %v5447_v57  ;;  %v1392_v10 = vpack.c.bf16 %v5032_v24, %v5031_v46 }
 0x51f   : > { %v5160_v61 = vpop.eup %5159  ;;  %5171 = vrcp.f32 %v2414_v60  ;;  %v1389_v47 = vpack.c.bf16 %v5017_v40, %v5016_v29  ;;  %v1390_v5 = vpack.c.bf16 %v5022_v33, %v5021_v8  ;;  %v1391_v17 = vpack.c.bf16 %v5027_v6, %v5026_v54  ;;  %v3230_v6 = vld [vmem:[#allocation10 + $0x4] sm:$0xf] }
 0x520   : > { %v2492_v37 = vmul.f32 %v5160_v61, %v6291_v51  ;;  %5173 = vrcp.f32 %v2417_v19  ;;  %4602 = vmatmul.mubr.msk.bf16.vlgmr.msra.gmra.mxu0 %vm2156_vm4, %v2515_v22  ;;  %v5162_v7 = vpop.eup %5161 }
 0x521   : > { %4612 = vmatpush3.bf16.msra.mxu0 %v1387_v42  ;;  %4613 = vmatprep.mubr.msk.bf16.mxu0 %vm5448_vm2, %v5447_v57  ;;  %v2493_v32 = vmul.f32 %v5162_v7, %v6293_v53 }
 0x522   : > { %v2420_v62 = vpop.xlane.xlu1 %2419  ;;  %v2516_v63 = vpack.c.bf16 %v2492_v37, %v2491_v58  ;;  %4623 = vmatprep.subr.bf16.mxu0 %v5447_v57 }
 0x523   : > { %5175 = vrcp.f32 %v2420_v62 }
 0x524   : > { %v5164_v12 = vpop.eup %5163  ;;  %4608 = vmatmul.mubr.msk.bf16.vlgmr.msra.gmra.mxu1 %vm2156_vm4, %v2516_v63 }
 0x525   : > { %v2429_v51 = vpop.xlane.xlu0 %2428  ;;  %4618 = vmatpush3.bf16.msra.mxu1 %v1388_v49  ;;  %v2494_v2 = vmul.f32 %v5164_v12, %v6303_v30  ;;  %4619 = vmatprep.mubr.msk.bf16.mxu1 %vm5448_vm2, %v5447_v57  ;;  %v5166_v3 = vpop.eup %5165 }
 0x526   : > { %v2423_v31 = vpop.xlane.xlu1 %2422  ;;  %4629 = vmatprep.subr.bf16.mxu1 %v5447_v57  ;;  %v2495_v30 = vmul.f32 %v5166_v3, %v6301_v27 }
 0x527   : > { %5177 = vrcp.f32 %v2423_v31  ;;  %v2517_v39 = vpack.c.bf16 %v2494_v2, %v2493_v32 }
 0x528   : > { %v5168_v52 = vpop.eup %5167  ;;  %5179 = vrcp.f32 %v2429_v51 }
 0x529   : > { %v2426_v50 = vpop.xlane.xlu0 %2425  ;;  %4614 = vmatmul.mubr.msk.bf16.vlgmr.msra.gmra.mxu0 %vm2156_vm4, %v2517_v39  ;;  %v2496_v0 = vmul.f32 %v5168_v52, %v6311_v34  ;;  %v5170_v23 = vpop.eup %5169 }
 0x52a   : > { %5181 = vrcp.f32 %v2426_v50  ;;  %v2432_v53 = vpop.xlane.xlu1 %2431  ;;  %4624 = vmatpush3.bf16.msra.mxu0 %v1389_v47  ;;  %4625 = vmatprep.mubr.msk.bf16.mxu0 %vm5448_vm2, %v5447_v57  ;;  %v2497_v34 = vmul.f32 %v5170_v23, %v6313_v43 }
 0x52b   : > { %5183 = vrcp.f32 %v2432_v53  ;;  %v2518_v13 = vpack.c.bf16 %v2496_v0, %v2495_v30  ;;  %4635 = vmatprep.subr.bf16.mxu0 %v5447_v57 }
 0x52c   : > { %v5172_v18 = vpop.eup %5171 }
 0x52d   : > { %v2441_v38 = vpop.xlane.xlu0 %2440  ;;  %v5174_v16 = vpop.eup %5173  ;;  %4620 = vmatmul.mubr.msk.bf16.vlgmr.msra.gmra.mxu1 %vm2156_vm4, %v2518_v13  ;;  %v2498_v28 = vmul.f32 %v5172_v18, %v6323_v48 }
 0x52e   : > { %v2435_v27 = vpop.xlane.xlu1 %2434  ;;  %4630 = vmatpush3.bf16.msra.mxu1 %v1390_v5  ;;  %4631 = vmatprep.mubr.msk.bf16.mxu1 %vm5448_vm2, %v5447_v57  ;;  %v2499_v43 = vmul.f32 %v5174_v16, %v6321_v56  ;;  %v3432_v5 = vsel %vm564_vm1, %v3230_v6, 0 }
 0x52f   : > { %5185 = vrcp.f32 %v2435_v27  ;;  %v2519_v36 = vpack.c.bf16 %v2498_v28, %v2497_v34  ;;  %4641 = vmatprep.subr.bf16.mxu1 %v5447_v57 }
 0x530   : > { %v5176_v9 = vpop.eup %5175  ;;  %5187 = vrcp.f32 %v2441_v38 }
 0x531   : > { %v2438_v45 = vpop.xlane.xlu0 %2437  ;;  %v2500_v48 = vmul.f32 %v5176_v9, %v6330_v21  ;;  %4626 = vmatmul.mubr.msk.bf16.vlgmr.msra.gmra.mxu0 %vm2156_vm4, %v2519_v36 }
 0x532   : > { %5189 = vrcp.f32 %v2438_v45  ;;  %v2444_v55 = vpop.xlane.xlu1 %2443  ;;  %4636 = vmatpush3.bf16.msra.mxu0 %v1391_v17  ;;  %4637 = vmatprep.mubr.msk.bf16.mxu0 %vm5448_vm2, %v5447_v57 }
 0x533   : > { %5191 = vrcp.f32 %v2444_v55  ;;  %v2520_v11 = vpack.c.bf16 %v2500_v48, %v2499_v43  ;;  %4647 = vmatprep.subr.bf16.mxu0 %v5447_v57 }
 0x534   : > { %v5178_v14 = vpop.eup %5177 }
 0x535   : > { %v5035_v19 = vpop.permute.xlu0 %5034  ;;  %v5180_v60 = vpop.eup %5179  ;;  %4632 = vmatmul.mubr.msk.bf16.vlgmr.msra.gmra.mxu1 %vm2156_vm4, %v2520_v11  ;;  %v2501_v22 = vmul.f32 %v5178_v14, %v6334_v59 }
 0x536   : > { %v5040_v56 = vpop.permute.xlu1 %5039  ;;  %4642 = vmatpush3.bf16.msra.mxu1 %v1392_v10  ;;  %v5037_v61 = vunpack.i.h.bf16 %v5035_v19  ;;  %v5036_v42 = vunpack.i.l.bf16 %v5035_v19  ;;  %4643 = vmatprep.mubr.msk.bf16.mxu1 %vm5448_vm2, %v5447_v57  ;;  %v2503_v62 = vmul.f32 %v5180_v60, %v6336_v20  ;;  %v3229_v20 = vld [vmem:[#allocation10] sm:$0xf]  ;;  %v3231_v19 = vld [vmem:[#allocation10 + $0x8] sm:$0xf] }
 0x537   : > { %v5182_v21 = vpop.eup %5181  ;;  %4653 = vmatprep.subr.bf16.mxu1 %v5447_v57  ;;  %v5042_v58 = vunpack.i.h.bf16 %v5040_v56  ;;  %v5041_v37 = vunpack.i.l.bf16 %v5040_v56  ;;  %v3253_v39 = vsel %vm564_vm1, %v3229_v20, 0 }
 0x538   : > { %v5184_v4 = vpop.eup %5183  ;;  %v2502_v15 = vmul.f32 %v5182_v21, %v6340_v25  ;;  %v1393_v49 = vpack.c.bf16 %v5037_v61, %v5036_v42  ;;  %v3611_v61 = vsel %vm564_vm1, %v3231_v19, 0 }
 0x539   : > { %v2504_v63 = vmul.f32 %v5184_v4, %v6344_v26  ;;  %v1394_v29 = vpack.c.bf16 %v5042_v58, %v5041_v37 }
 0x53a   : > { %v2521_v7 = vpack.c.bf16 %v2502_v15, %v2501_v22 }
 0x53b   : > { %v2522_v12 = vpack.c.bf16 %v2504_v63, %v2503_v62 }
 0x53c   : > { %4638 = vmatmul.mubr.msk.bf16.vlgmr.msra.gmra.mxu0 %vm2156_vm4, %v2521_v7  ;;  %v5186_v40 = vpop.eup %5185 }
 0x53d   : > { %4648 = vmatpush3.bf16.msra.mxu0 %v1393_v49  ;;  %4649 = vmatprep.mubr.msk.bf16.mxu0 %vm5448_vm2, %v5447_v57  ;;  %v5188_v59 = vpop.eup %5187  ;;  %v2505_v51 = vmul.f32 %v5186_v40, %v6350_v35 }
 0x53e   : > { %4644 = vmatmul.mubr.msk.bf16.vlgmr.msra.gmra.mxu1 %vm2156_vm4, %v2522_v12  ;;  %4659 = vmatprep.subr.bf16.mxu0 %v5447_v57  ;;  %v2507_v32 = vmul.f32 %v5188_v59, %v6352_v44 }
 0x53f   : > { %v5190_v25 = vpop.eup %5189  ;;  %4654 = vmatpush3.bf16.msra.mxu1 %v1394_v29  ;;  %4655 = vmatprep.mubr.msk.bf16.mxu1 %vm5448_vm2, %v5447_v57 }
 0x540   : > { %v5192_v26 = vpop.eup %5191  ;;  %v2506_v31 = vmul.f32 %v5190_v25, %v6356_v1  ;;  %4665 = vmatprep.subr.bf16.mxu1 %v5447_v57 }
 0x541   : > { %v2508_v2 = vmul.f32 %v5192_v26, %v6360_v41 }
 0x542   : > { %v2523_v3 = vpack.c.bf16 %v2506_v31, %v2505_v51  ;;  %v3232_v51 = vld [vmem:[#allocation10 + $0xc] sm:$0xf] }
 0x543   : > { %v2524_v52 = vpack.c.bf16 %v2508_v2, %v2507_v32 }
 0x544   : > { %4650 = vmatmul.mubr.msk.bf16.vlgmr.msra.gmra.mxu0 %vm2156_vm4, %v2523_v3  ;;  %v3790_v3 = vsel %vm564_vm1, %v3232_v51, 0 }
 0x545   : > { %4660 = vmatpush3.bf16.msra.mxu0 %v3253_v39  ;;  %4661 = vmatprep.mubr.msk.bf16.mxu0 %vm5448_vm2, %v5447_v57 }
 0x546   : > { %4656 = vmatmul.mubr.msk.bf16.vlgmr.msra.gmra.mxu1 %vm2156_vm4, %v2524_v52  ;;  %4671 = vmatprep.subr.bf16.mxu0 %v5447_v57 }
 0x547   : > { %4666 = vmatpush3.bf16.msra.mxu1 %v3253_v39  ;;  %4667 = vmatprep.mubr.msk.bf16.mxu1 %vm5448_vm2, %v5447_v57 }
 0x548   : > { %4677 = vmatprep.subr.bf16.mxu1 %v5447_v57 }
 0x59c   : > { %v2562_v35 = vpop.f32.mrf.mxu0 }
 0x59e   : > { %v4567_v44 = vpop.f32.mrf.mxu0 }
 0x5a0   : > { %v2565_v1 = vpop.f32.mrf.mxu0  ;;  %v2606_v41 = vpop.f32.mrf.mxu1 }
 0x5a1   : > { %v3233_v47 = vpack.c.bf16 %v2565_v1, %v2562_v35 }
 0x5a2   : > { %v4568_v33 = vpop.f32.mrf.mxu0  ;;  %v4573_v8 = vpop.f32.mrf.mxu1 }
 0x5a3   : > { %4662 = vmatmul.mubr.msk.bf16.vlgmr.msra.gmra.mxu0 %vm1403_vm3, %v3233_v47 }
 0x5a4   : > { %v2609_v50 = vpop.f32.mrf.mxu1  ;;  %v2650_v53 = vpop.f32.mrf.mxu0  ;;  %4672 = vmatpush3.bf16.msra.mxu0 %v3253_v39  ;;  %4673 = vmatprep.mubr.msk.bf16.mxu0 %vm5448_vm2, %v5447_v57 }
 0x5a5   : > { %v3234_v30 = vpack.c.bf16 %v2609_v50, %v2606_v41  ;;  %4683 = vmatprep.subr.bf16.mxu0 %v5447_v57 }
 0x5a6   : > { %v4574_v0 = vpop.f32.mrf.mxu1  ;;  %v4579_v23 = vpop.f32.mrf.mxu0 }
 0x5a7   : > { %4668 = vmatmul.mubr.msk.bf16.vlgmr.msra.gmra.mxu1 %vm1403_vm3, %v3234_v30 }
 0x5a8   : > { %v2653_v54 = vpop.f32.mrf.mxu0  ;;  %v2694_v13 = vpop.f32.mrf.mxu1  ;;  %4678 = vmatpush3.bf16.msra.mxu1 %v3253_v39  ;;  %4679 = vmatprep.mubr.msk.bf16.mxu1 %vm5448_vm2, %v5447_v57 }
 0x5a9   : > { %v3235_v18 = vpack.c.bf16 %v2653_v54, %v2650_v53  ;;  %4689 = vmatprep.subr.bf16.mxu1 %v5447_v57 }
 0x5aa   : > { %v4580_v38 = vpop.f32.mrf.mxu0  ;;  %v4585_v16 = vpop.f32.mrf.mxu1 }
 0x5ab   : > { %4674 = vmatmul.mubr.msk.bf16.vlgmr.msra.gmra.mxu0 %vm1403_vm3, %v3235_v18 }
 0x5ac   : > { %v2697_v27 = vpop.f32.mrf.mxu1  ;;  %4684 = vmatpush3.bf16.msra.mxu0 %v3432_v5  ;;  %4685 = vmatprep.mubr.msk.bf16.mxu0 %vm5448_vm2, %v5447_v57 }
 0x5ad   : > { %v3236_v34 = vpack.c.bf16 %v2697_v27, %v2694_v13  ;;  %4695 = vmatprep.subr.bf16.mxu0 %v5447_v57 }
 0x5ae   : > { %v4586_v28 = vpop.f32.mrf.mxu1 }
 0x5af   : > { %4680 = vmatmul.mubr.msk.bf16.vlgmr.msra.gmra.mxu1 %vm1403_vm3, %v3236_v34 }
 0x5b0   : > { %4690 = vmatpush3.bf16.msra.mxu1 %v3432_v5  ;;  %4691 = vmatprep.mubr.msk.bf16.mxu1 %vm5448_vm2, %v5447_v57 }
 0x5b1   : > { %4701 = vmatprep.subr.bf16.mxu1 %v5447_v57 }
 0x5d8   : > { %v2738_v9 = vpop.f32.mrf.mxu0 }
 0x5da   : > { %v4591_v17 = vpop.f32.mrf.mxu0 }
 0x5dc   : > { %v2741_v24 = vpop.f32.mrf.mxu0  ;;  %v2782_v46 = vpop.f32.mrf.mxu1 }
 0x5dd   : > { %v3237_v36 = vpack.c.bf16 %v2741_v24, %v2738_v9 }
 0x5de   : > { %v4592_v45 = vpop.f32.mrf.mxu0  ;;  %v4597_v43 = vpop.f32.mrf.mxu1 }
 0x5df   : > { %4686 = vmatmul.mubr.msk.bf16.vlgmr.msra.gmra.mxu0 %vm1403_vm3, %v3237_v36 }
 0x5e0   : > { %4696 = vmatpush3.bf16.msra.mxu0 %v3432_v5  ;;  %4697 = vmatprep.mubr.msk.bf16.mxu0 %vm5448_vm2, %v5447_v57  ;;  %v2785_v48 = vpop.f32.mrf.mxu1  ;;  %v2826_v55 = vpop.f32.mrf.mxu0 }
 0x5e1   : > { %4707 = vmatprep.subr.bf16.mxu0 %v5447_v57  ;;  %v3238_v11 = vpack.c.bf16 %v2785_v48, %v2782_v46 }
 0x5e2   : > { %v4598_v14 = vpop.f32.mrf.mxu1  ;;  %v4603_v10 = vpop.f32.mrf.mxu0 }
 0x5e3   : > { %4692 = vmatmul.mubr.msk.bf16.vlgmr.msra.gmra.mxu1 %vm1403_vm3, %v3238_v11 }
 0x5e4   : > { %v2829_v60 = vpop.f32.mrf.mxu0  ;;  %v2870_v56 = vpop.f32.mrf.mxu1  ;;  %4702 = vmatpush3.bf16.msra.mxu1 %v3432_v5  ;;  %4703 = vmatprep.mubr.msk.bf16.mxu1 %vm5448_vm2, %v5447_v57 }
 0x5e5   : > { %v3239_v21 = vpack.c.bf16 %v2829_v60, %v2826_v55  ;;  %4713 = vmatprep.subr.bf16.mxu1 %v5447_v57 }
 0x5e6   : > { %v4604_v42 = vpop.f32.mrf.mxu0  ;;  %v4609_v4 = vpop.f32.mrf.mxu1 }
 0x5e7   : > { %4698 = vmatmul.mubr.msk.bf16.vlgmr.msra.gmra.mxu0 %vm1403_vm3, %v3239_v21 }
 0x5e8   : > { %v2873_v22 = vpop.f32.mrf.mxu1  ;;  %4708 = vmatpush3.bf16.msra.mxu0 %v3611_v61  ;;  %4709 = vmatprep.mubr.msk.bf16.mxu0 %vm5448_vm2, %v5447_v57 }
 0x5e9   : > { %v3240_v15 = vpack.c.bf16 %v2873_v22, %v2870_v56  ;;  %v2914_v58 = vpop.f32.mrf.mxu0  ;;  %4719 = vmatprep.subr.bf16.mxu0 %v5447_v57 }
 0x5ea   : > { %v4610_v37 = vpop.f32.mrf.mxu1 }
 0x5eb   : > { %v4615_v62 = vpop.f32.mrf.mxu0  ;;  %4704 = vmatmul.mubr.msk.bf16.vlgmr.msra.gmra.mxu1 %vm1403_vm3, %v3240_v15 }
 0x5ec   : > { %4714 = vmatpush3.bf16.msra.mxu1 %v3611_v61  ;;  %4715 = vmatprep.mubr.msk.bf16.mxu1 %vm5448_vm2, %v5447_v57 }
 0x5ed   : > { %v2917_v63 = vpop.f32.mrf.mxu0  ;;  %v2958_v7 = vpop.f32.mrf.mxu1  ;;  %4725 = vmatprep.subr.bf16.mxu1 %v5447_v57 }
 0x5ee   : > { %v3241_v49 = vpack.c.bf16 %v2917_v63, %v2914_v58 }
 0x5ef   : > { %v4616_v12 = vpop.f32.mrf.mxu0  ;;  %v4621_v40 = vpop.f32.mrf.mxu1 }
 0x5f0   : > { %4710 = vmatmul.mubr.msk.bf16.vlgmr.msra.gmra.mxu0 %vm1403_vm3, %v3241_v49 }
 0x5f1   : > { %v2961_v29 = vpop.f32.mrf.mxu1  ;;  %v3002_v59 = vpop.f32.mrf.mxu0  ;;  %4720 = vmatpush3.bf16.msra.mxu0 %v3611_v61  ;;  %4721 = vmatprep.mubr.msk.bf16.mxu0 %vm5448_vm2, %v5447_v57 }
 0x5f2   : > { %v3242_v25 = vpack.c.bf16 %v2961_v29, %v2958_v7  ;;  %4731 = vmatprep.subr.bf16.mxu0 %v5447_v57 }
 0x5f3   : > { %v4622_v20 = vpop.f32.mrf.mxu1  ;;  %v4627_v26 = vpop.f32.mrf.mxu0 }
 0x5f4   : > { %4716 = vmatmul.mubr.msk.bf16.vlgmr.msra.gmra.mxu1 %vm1403_vm3, %v3242_v25 }
 0x5f5   : > { %v3005_v31 = vpop.f32.mrf.mxu0  ;;  %v3046_v32 = vpop.f32.mrf.mxu1  ;;  %4726 = vmatpush3.bf16.msra.mxu1 %v3611_v61  ;;  %4727 = vmatprep.mubr.msk.bf16.mxu1 %vm5448_vm2, %v5447_v57 }
 0x5f6   : > { %v3243_v2 = vpack.c.bf16 %v3005_v31, %v3002_v59  ;;  %4737 = vmatprep.subr.bf16.mxu1 %v5447_v57 }
 0x5f7   : > { %v4628_v39 = vpop.f32.mrf.mxu0  ;;  %v4633_v52 = vpop.f32.mrf.mxu1 }
 0x5f8   : > { %4722 = vmatmul.mubr.msk.bf16.vlgmr.msra.gmra.mxu0 %vm1403_vm3, %v3243_v2 }
 0x5f9   : > { %v3049_v35 = vpop.f32.mrf.mxu1  ;;  %4732 = vmatpush3.bf16.msra.mxu0 %v3790_v3  ;;  %4733 = vmatprep.mubr.msk.bf16.mxu0 %vm5448_vm2, %v5447_v57 }
 0x5fa   : > { %v3244_v44 = vpack.c.bf16 %v3049_v35, %v3046_v32  ;;  %4743 = vmatprep.subr.bf16.mxu0 %v5447_v57 }
 0x5fb   : > { %v4634_v1 = vpop.f32.mrf.mxu1 }
 0x5fc   : > { %v3090_v41 = vpop.f32.mrf.mxu0  ;;  %4728 = vmatmul.mubr.msk.bf16.vlgmr.msra.gmra.mxu1 %vm1403_vm3, %v3244_v44 }
 0x5fd   : > { %4738 = vmatpush3.bf16.msra.mxu1 %v3790_v3  ;;  %4739 = vmatprep.mubr.msk.bf16.mxu1 %vm5448_vm2, %v5447_v57 }
 0x5fe   : > { %v3134_v47 = vpop.f32.mrf.mxu1  ;;  %v4639_v33 = vpop.f32.mrf.mxu0  ;;  %4749 = vmatprep.subr.bf16.mxu1 %v5447_v57 }
 0x600   : > { %v4645_v8 = vpop.f32.mrf.mxu1  ;;  %v3093_v50 = vpop.f32.mrf.mxu0 }
 0x601   : > { %v3245_v53 = vpack.c.bf16 %v3093_v50, %v3090_v41  ;;  %v5193_v41 = vld [vmem:[%s5686_s9] sm:$0xff]  ;;  %v5194_v50 = vld [vmem:[%s5686_s9 + $0x10] sm:$0xff] }
 0x602   : > { %v3137_v30 = vpop.f32.mrf.mxu1  ;;  %v4640_v0 = vpop.f32.mrf.mxu0 }
 0x603   : > { %v3246_v23 = vpack.c.bf16 %v3137_v30, %v3134_v47  ;;  %4734 = vmatmul.mubr.msk.bf16.vlgmr.msra.gmra.mxu0 %vm1403_vm3, %v3245_v53 }
 0x604   : > { %v4646_v6 = vpop.f32.mrf.mxu1  ;;  %v3178_v54 = vpop.f32.mrf.mxu0  ;;  %4744 = vmatpush3.bf16.msra.mxu0 %v3790_v3  ;;  %4745 = vmatprep.mubr.msk.bf16.mxu0 %vm5448_vm2, %v5447_v57 }
 0x605   : > { %4740 = vmatmul.mubr.msk.bf16.vlgmr.msra.gmra.mxu1 %vm1403_vm3, %v3246_v23  ;;  %v5195_v23 = vld [vmem:[%s5686_s9 + $0x8] sm:$0xff] }
 0x606   : > { %v3222_v13 = vpop.f32.mrf.mxu1  ;;  %4750 = vmatpush3.bf16.msra.mxu1 %v3790_v3  ;;  %v4651_v18 = vpop.f32.mrf.mxu0  ;;  %4751 = vmatprep.mubr.msk.bf16.mxu1 %vm5448_vm2, %v5447_v57 }
 0x608   : > { %v4657_v5 = vpop.f32.mrf.mxu1  ;;  %v3181_v38 = vpop.f32.mrf.mxu0 }
 0x609   : > { %v3247_v16 = vpack.c.bf16 %v3181_v38, %v3178_v54  ;;  %v5196_v38 = vld [vmem:[%s5686_s9 + $0x18] sm:$0xff] }
 0x60a   : > { %v3225_v27 = vpop.f32.mrf.mxu1  ;;  %v4652_v34 = vpop.f32.mrf.mxu0 }
 0x60b   : > { %v3248_v28 = vpack.c.bf16 %v3225_v27, %v3222_v13  ;;  %4746 = vmatmul.mubr.msk.bf16.vlgmr.msra.gmra.mxu0 %vm1403_vm3, %v3247_v16 }
 0x60c   : > { %v4658_v9 = vpop.f32.mrf.mxu1 }
 0x60d   : > { %4752 = vmatmul.mubr.msk.bf16.vlgmr.msra.gmra.mxu1 %vm1403_vm3, %v3248_v28 }
 0x663   : > { %v3289_v17 = vpop.f32.mrf.mxu0 }
 0x664   : > { %v3965_v47 = vadd.f32 %v5193_v41, %v3289_v17 }
 0x665   : > { %v4663_v24 = vpop.f32.mrf.mxu0 }
 0x666   : > { %v5197_v24 = vld [vmem:[%s5686_s9 + $0x20] sm:$0xff] }
 0x667   : > { %v3292_v36 = vpop.f32.mrf.mxu0  ;;  %v3333_v46 = vpop.f32.mrf.mxu1 }
 0x668   : > { %v3967_v53 = vadd.f32 %v5194_v50, %v3333_v46  ;;  %v3966_v6 = vadd.f32 %v5195_v23, %v3292_v36 }
 0x669   : > { %v4664_v45 = vpop.f32.mrf.mxu0  ;;  %v4669_v43 = vpop.f32.mrf.mxu1 }
 0x66b   : > { %v3336_v48 = vpop.f32.mrf.mxu1  ;;  %v3377_v55 = vpop.f32.mrf.mxu0 }
 0x66c   : > { %v3968_v16 = vadd.f32 %v5196_v38, %v3336_v48  ;;  %v3969_v46 = vadd.f32 %v5197_v24, %v3377_v55 }
 0x66d   : > { %v4670_v57 = vpop.f32.mrf.mxu1  ;;  %v4675_v11 = vpop.f32.mrf.mxu0 }
 0x66e   : > { %v5198_v11 = vld [vmem:[%s5686_s9 + $0x30] sm:$0xff] }
 0x66f   : > { %v6556_v14 = vpop.f32.mrf.mxu0  ;;  %v6558_v10 = vpop.f32.mrf.mxu1 }
 0x671   : > { %v4676_v19 = vpop.f32.mrf.mxu0  ;;  %v4681_v60 = vpop.f32.mrf.mxu1 }
 0x672   : > { %v3971_v19 = vadd.f32 %v5198_v11, %v6558_v10 }
 0x673   : > { %v6560_v56 = vpop.f32.mrf.mxu1 }
 0x675   : > { %v4682_v21 = vpop.f32.mrf.mxu1 }
 0x69f   : > { %v3468_v61 = vpop.f32.mrf.mxu0 }
 0x6a0   : > { %v3973_v30 = vadd.f32 %v3965_v47, %v3468_v61 }
 0x6a1   : > { %v4687_v42 = vpop.f32.mrf.mxu0 }
 0x6a3   : > { %v3471_v4 = vpop.f32.mrf.mxu0  ;;  %v3512_v22 = vpop.f32.mrf.mxu1 }
 0x6a4   : > { %v3975_v54 = vadd.f32 %v3967_v53, %v3512_v22  ;;  %v3974_v27 = vadd.f32 %v3966_v6, %v3471_v4  ;;  %v5199_v4 = vld [vmem:[%s5686_s9 + $0x28] sm:$0xff] }
 0x6a5   : > { %v4688_v15 = vpop.f32.mrf.mxu0  ;;  %v4693_v58 = vpop.f32.mrf.mxu1  ;;  %v3970_v22 = vadd.f32 %v5199_v4, %v6556_v14 }
 0x6a7   : > { %v3515_v37 = vpop.f32.mrf.mxu1  ;;  %v3556_v62 = vpop.f32.mrf.mxu0 }
 0x6a8   : > { %v3976_v45 = vadd.f32 %v3968_v16, %v3515_v37  ;;  %v3977_v60 = vadd.f32 %v3969_v46, %v3556_v62 }
 0x6a9   : > { %v4694_v63 = vpop.f32.mrf.mxu1  ;;  %v4699_v7 = vpop.f32.mrf.mxu0 }
 0x6aa   : > { %v5200_v63 = vld [vmem:[%s5686_s9 + $0x38] sm:$0xff]  ;;  %s5359_s9 = scalar_lea.vmem %s6602_s18, 1024 }
 0x6ab   : > { %v6562_v49 = vpop.f32.mrf.mxu0  ;;  %v3600_v12 = vpop.f32.mrf.mxu1  ;;  %v3972_v7 = vadd.f32 %v5200_v63, %v6560_v56  ;;  %p5360_p10 = scmp.ne.s32.totalorder %s6602_s18, %s5359_s9  ;;  %p5367_p9 = scmp.lt.s32.totalorder %s5365_s16, %s5359_s9 }
 0x6ac   : > { %v3979_v15 = vadd.f32 %v3971_v19, %v3600_v12 }
 0x6ad   : > { %v4700_v40 = vpop.f32.mrf.mxu0  ;;  %v4705_v29 = vpop.f32.mrf.mxu1  ;;  %p5361_p0 = pnand %p5360_p10, %p6686_p11  ;;  %p5368_p1 = por %p5367_p9, %p5366_p5 }
 0x6ae   : > { %v3978_v40 = vadd.f32 %v3970_v22, %v6562_v49 }
 0x6af   : > { %v6564_v59 = vpop.f32.mrf.mxu1  ;;  %p5362_p13 = pneg %p5361_p0 }
 0x6b0   : > { %v3647_v25 = vpop.f32.mrf.mxu0 }
 0x6b1   : > { %v4706_v20 = vpop.f32.mrf.mxu1  ;;  %v3981_v13 = vadd.f32 %v3973_v30, %v3647_v25  ;;  %p5369_p3 = pnand %p5368_p1, %p5362_p13 }
 0x6b2   : > { %v4711_v26 = vpop.f32.mrf.mxu0  ;;  %v3980_v20 = vadd.f32 %v3972_v7, %v6564_v59 }
 0x6b4   : > { %v3650_v51 = vpop.f32.mrf.mxu0  ;;  %v3691_v31 = vpop.f32.mrf.mxu1 }
 0x6b5   : > { %v3983_v34 = vadd.f32 %v3975_v54, %v3691_v31  ;;  %v3982_v43 = vadd.f32 %v3974_v27, %v3650_v51 }
 0x6b6   : > { %v4712_v32 = vpop.f32.mrf.mxu0  ;;  %v4717_v2 = vpop.f32.mrf.mxu1 }
 0x6b8   : > { %v3694_v3 = vpop.f32.mrf.mxu1  ;;  %v3735_v39 = vpop.f32.mrf.mxu0 }
 0x6b9   : > { %v3984_v55 = vadd.f32 %v3976_v45, %v3694_v3  ;;  %v3985_v58 = vadd.f32 %v3977_v60, %v3735_v39 }
 0x6ba   : > { %v4718_v52 = vpop.f32.mrf.mxu1  ;;  %v4723_v35 = vpop.f32.mrf.mxu0 }
 0x6bc   : > { %v3738_v44 = vpop.f32.mrf.mxu0  ;;  %v3779_v1 = vpop.f32.mrf.mxu1 }
 0x6bd   : > { %v3987_v29 = vadd.f32 %v3979_v15, %v3779_v1  ;;  %v3986_v26 = vadd.f32 %v3978_v40, %v3738_v44 }
 0x6be   : > { %v4724_v33 = vpop.f32.mrf.mxu0  ;;  %v4729_v8 = vpop.f32.mrf.mxu1 }
 0x6c0   : > { %v3782_v0 = vpop.f32.mrf.mxu1 }
 0x6c1   : > { %v3988_v31 = vadd.f32 %v3980_v20, %v3782_v0 }
 0x6c2   : > { %v4730_v18 = vpop.f32.mrf.mxu1 }
 0x6c3   : > { %v3826_v5 = vpop.f32.mrf.mxu0 }
 0x6c4   : > { %v3989_v28 = vadd.f32 %v3981_v13, %v3826_v5 }
 0x6c5   : > { %v3870_v9 = vpop.f32.mrf.mxu1  ;;  %v4735_v17 = vpop.f32.mrf.mxu0 }
 0x6c6   : > { %3997 = vst.msk [vmem:[%s6573_s22] sm:$0xff] %vm411_vm0, %v3989_v28  ;;  %v3991_v36 = vadd.f32 %v3983_v34, %v3870_v9 }
 0x6c7   : > { %v4741_v48 = vpop.f32.mrf.mxu1  ;;  %v3829_v57 = vpop.f32.mrf.mxu0 }
 0x6c8   : > { %3999 = vst.msk [vmem:[%s6573_s22 + $0x10] sm:$0xff] %vm411_vm0, %v3991_v36  ;;  %v3990_v21 = vadd.f32 %v3982_v43, %v3829_v57 }
 0x6c9   : > { %v3873_v61 = vpop.f32.mrf.mxu1  ;;  %v4736_v42 = vpop.f32.mrf.mxu0 }
 0x6ca   : > { %3998 = vst.msk [vmem:[%s6573_s22 + $0x8] sm:$0xff] %vm411_vm0, %v3990_v21  ;;  %v3992_v37 = vadd.f32 %v3984_v55, %v3873_v61 }
 0x6cb   : > { %v4742_v10 = vpop.f32.mrf.mxu1  ;;  %v3914_v62 = vpop.f32.mrf.mxu0 }
 0x6cc   : > { %4000 = vst.msk [vmem:[%s6573_s22 + $0x18] sm:$0xff] %vm411_vm0, %v3992_v37  ;;  %v3993_v14 = vadd.f32 %v3985_v58, %v3914_v62 }
 0x6cd   : > { %v3958_v12 = vpop.f32.mrf.mxu1  ;;  %v4747_v25 = vpop.f32.mrf.mxu0 }
 0x6ce   : > { %4001 = vst.msk [vmem:[%s6573_s22 + $0x20] sm:$0xff] %vm411_vm0, %v3993_v14  ;;  %v3995_v51 = vadd.f32 %v3987_v29, %v3958_v12 }
 0x6cf   : > { %v4753_v56 = vpop.f32.mrf.mxu1  ;;  %v3917_v49 = vpop.f32.mrf.mxu0 }
 0x6d0   : > { %4003 = vst.msk [vmem:[%s6573_s22 + $0x30] sm:$0xff] %vm411_vm0, %v3995_v51  ;;  %v3994_v32 = vadd.f32 %v3986_v26, %v3917_v49 }
 0x6d1   : > { %v3961_v2 = vpop.f32.mrf.mxu1  ;;  %v4748_v3 = vpop.f32.mrf.mxu0 }
 0x6d2   : > { %4002 = vst.msk [vmem:[%s6573_s22 + $0x28] sm:$0xff] %vm411_vm0, %v3994_v32  ;;  %v3996_v59 = vadd.f32 %v3988_v31, %v3961_v2 }
 0x6d3   : > { %v4754_v39 = vpop.f32.mrf.mxu1 }
 0x6d4   : > { %4004 = vst.msk [vmem:[%s6573_s22 + $0x38] sm:$0xff] %vm411_vm0, %v3996_v59 }
 0x6d5   : > { %5372 = shalt.err (!%p5369_p3)
}
 0x6d6   : > { %s5373_s21 = scalar_lea.hbm %s6600_s17, 1024  ;;  %s5377_s13 = scalar_lea.hbm %s6657_s8, 2048 }
 0x6d7   : > { %p5374_p4 = scmp.ne.s32.totalorder %s6600_s17, %s5373_s21  ;;  %p5378_p2 = scmp.lt.s32.totalorder %s6600_s17, %s6657_s8 }
 0x6d8   : > { %p5379_p7 = scmp.lt.s32.totalorder %s5377_s13, %s5373_s21 }
 0x6d9   : > { %p5375_p12 = pnand %p5374_p4, %p6686_p11 }
 0x6da   : > { %p5380_p8 = por %p5379_p7, %p5378_p2 }
 0x6db   : > { %p5376_p6 = pneg %p5375_p12 }
 0x6dd   : > { %p5381_p10 = pnand %p5380_p8, %p5376_p6 }
 0x6df   : > { %5384 = shalt.err (!%p5381_p10)
}
 0x6e0   : > { %s5453_s25 = smov 128   ;;  %s5454_s4 = smov 8  }
 0x6e1   : > { %4777 = dma.vmem_to_hbm [thread:$0]  (%p6686_p11), %s6602_s18, 1024, %s6600_s17, %s4006_s11, %s5453_s25, %s5453_s25, %s5454_s4  }
 0x6e2 PF: > { %s4035_s9 = sand.u32 1, %s5423_s27   ;;  %p6687_p0 = scmp.ne.s32.totalorder %s6673_s23, 0 }
 0x6e3   : > { %p6688_p13 = scmp.ge.s32.totalorder %s5435_s30, 2  ;;  %s4036_s12 = scalar_lea.sflag [#allocation4], %s4035_s9 }
 0x6e5   : > { %p4800_p5 = pnand %p6688_p13, %p6687_p0 }
 0x6e7   : > { %p4801_p9 = pneg %p4800_p5 }
 0x6e9   : > { %5418 = dma.done.wait (%p4801_p9), %s4036_s12, 1024  }
 0x6ea   : > { %5420 = vsyncadd (%p4801_p9), %s4036_s12, 4294966272  ;;  %p24_p1 = scmp.ge.s32.totalorder %s5611_s10, 4   ;;  %s6689_s27 = smov %s5427_s28 }
 0x6eb   : > { %s6690_s28 = smov %s5431_s29  ;;  %s6691_s29 = smov %s5623_s15 }
 0x6ec   : > { %s6692_s30 = smov %s5611_s10  ;;  %26 = sbr.rel (!%p24_p1) target bundleno = 11 (0xb), region = 117 }
 0x6f1   :  { %4041 = vsyncpa [#allocation3], 1 }
 0x6f2   :  { %4043 = vsyncpa [#allocation3 + $0x1], 1 }
 0x6f3   :  { %4044 = vsyncpa [#allocation6], 1 }
 0x6f4   :  { %4045 = vsyncpa [#allocation9], 1 }
 0x6f5   :  { %4046 = vsyncpa [#allocation12], 1 }
 0x6f6   :  { %4047 = vsyncpa [#allocation4], 1 }
 0x6f7   :  { %4049 = vsyncpa [#allocation4 + $0x1], 1 }

</bundles_post_ra>
